<compile_context>
chip_gen: v7x
topology: tpu7x:2x2x1
jax: 0.10.0
libtpu: 0.0.40
codegen_flags: <defaults>
</compile_context>

<pallas_src>
import functools
import math

import jax
import jax.numpy as jnp
from jax import lax
from jax.experimental import pallas as pl
from jax.experimental.pallas import tpu as pltpu

# Safe on v7x (64 MiB physical VMEM); v5e/v6e have 128 MiB.  Actual per-step
# working sets below are only a few MiB.
_VMEM_LIMIT = 48 * 1024 * 1024

_MASK_VALUE = -0.7 * float(jnp.finfo(jnp.float32).max)
_MAX_UNROLLED_HEADS = 8


def _pick_tile(dim, pref, aligns=(256, 128)):
    """Largest tile <= pref that divides dim and is a multiple of one of `aligns`
    (tried in order: 256-aligned preferred for the 256x256 MXU on v6e/v7x),
    falling back to the full dimension (always a legal block shape)."""
    if dim <= pref:
        return dim
    for align in aligns:
        t = (min(pref, dim) // align) * align
        while t >= align:
            if dim % t == 0:
                return t
            t -= align
    # TODO(synk): pad instead of falling back to the full dimension; a full-T /
    # full-M block for non-128-multiple sizes could exceed VMEM on v7x.
    return dim


# ----------------------------- Linear (c_attn / c_proj) -----------------------------

def _linear_bias_kernel(x_ref, w_ref, b_ref, o_ref):
    # Single-K-step path: no accumulator scratch, no per-step read-modify-write.
    o_ref[...] = (
        jnp.dot(x_ref[...], w_ref[...], preferred_element_type=jnp.float32)
        + b_ref[...]
    ).astype(o_ref.dtype)


def _linear_acc_kernel(x_ref, w_ref, b_ref, o_ref, acc_ref):
    k = pl.program_id(2)

    @pl.when(k == 0)
    def _init():
        acc_ref[...] = jnp.zeros_like(acc_ref)

    # bf16 operands (already bf16 in HBM) on the MXU, f32 accumulation.
    acc_ref[...] += jnp.dot(x_ref[...], w_ref[...],
                            preferred_element_type=jnp.float32)

    @pl.when(k == pl.num_programs(2) - 1)
    def _epilogue():
        o_ref[...] = (acc_ref[...] + b_ref[...]).astype(o_ref.dtype)


def linear(x2d, w, b, *, tm_pref=512, tn_pref=512, tk_pref=512):
    """x2d: (M, K) bf16, w: (K, N) bf16, b: (N,) f32 -> (M, N) in x2d.dtype."""
    M, K = x2d.shape
    K2, N = w.shape
    assert K == K2
    tm = _pick_tile(M, tm_pref)
    tn = _pick_tile(N, tn_pref)
    tk = _pick_tile(K, tk_pref)
    b2 = b.reshape(1, N)

    if tk == K:
        # Whole contraction dim fits in one tile: write o_ref directly.
        return pl.pallas_call(
            _linear_bias_kernel,
            out_shape=jax.ShapeDtypeStruct((M, N), x2d.dtype),
            grid=(M // tm, N // tn),
            in_specs=[
                pl.BlockSpec((tm, K), lambda i, j: (i, 0)),
                pl.BlockSpec((K, tn), lambda i, j: (0, j)),
                pl.BlockSpec((1, tn), lambda i, j: (0, j)),
            ],
            out_specs=pl.BlockSpec((tm, tn), lambda i, j: (i, j)),
            compiler_params=pltpu.CompilerParams(
                dimension_semantics=("parallel", "parallel"),
                vmem_limit_bytes=_VMEM_LIMIT,
            ),
        )(x2d, w, b2)

    return pl.pallas_call(
        _linear_acc_kernel,
        out_shape=jax.ShapeDtypeStruct((M, N), x2d.dtype),
        grid=(M // tm, N // tn, K // tk),
        in_specs=[
            pl.BlockSpec((tm, tk), lambda i, j, k: (i, k)),
            pl.BlockSpec((tk, tn), lambda i, j, k: (k, j)),
            pl.BlockSpec((1, tn), lambda i, j, k: (0, j)),
        ],
        out_specs=pl.BlockSpec((tm, tn), lambda i, j, k: (i, j)),
        scratch_shapes=[pltpu.VMEM((tm, tn), jnp.float32)],
        compiler_params=pltpu.CompilerParams(
            dimension_semantics=("parallel", "parallel", "arbitrary"),
            vmem_limit_bytes=_VMEM_LIMIT,
        ),
    )(x2d, w, b2)


# ------------------------- Causal flash attention (all heads / step) ----------------

def _flash_attn_kernel(q_ref, k_ref, v_ref, o_ref, m_sc, l_sc, acc_sc, q_scr,
                       *, n_head):
    qi = pl.program_id(1)
    ki = pl.program_id(2)
    tq = q_ref.shape[1]
    tk = k_ref.shape[1]
    C = q_ref.shape[-1]
    D = C // n_head
    unrolled = n_head <= _MAX_UNROLLED_HEADS

    def for_each_head(body):
        if unrolled:
            for h in range(n_head):
                body(h)
        else:
            # Guard against vreg spills / instruction bloat at real model sizes.
            def step(h, carry):
                body(h)
                return carry
            lax.fori_loop(0, n_head, step, 0, unroll=2)

    # Index of the last kv tile containing any causally-valid key for this q tile.
    last_ki = (qi * tq + tq - 1) // tk

    @pl.when(ki == 0)
    def _init():
        m_sc[...] = jnp.full_like(m_sc, -jnp.inf)
        l_sc[...] = jnp.zeros_like(l_sc)
        acc_sc[...] = jnp.zeros_like(acc_sc)

        # Hoist per-head q lane-slicing out of the kv loop: done once per q tile.
        def unpack_q(h):
            q_scr[h] = q_ref[0, :, pl.ds(h * D, D)]

        for_each_head(unpack_q)

    def process(masked):
        if masked:
            q_pos = qi * tq + lax.broadcasted_iota(jnp.int32, (tq, tk), 0)
            k_pos = ki * tk + lax.broadcasted_iota(jnp.int32, (tq, tk), 1)
            causal = q_pos >= k_pos

        def head_body(h):
            k_h = k_ref[0, :, pl.ds(h * D, D)]                    # (tk, D) bf16
            v_h = v_ref[0, :, pl.ds(h * D, D)]                    # (tk, D) bf16
            # Q.K^T contracting the head dim directly (no transpose of K).
            # 1/sqrt(D) is already folded into the c_attn q weights on the host.
            s = lax.dot_general(
                q_scr[h], k_h, (((1,), (1,)), ((), ())),
                preferred_element_type=jnp.float32,
            )                                                      # (tq, tk) f32
            if masked:
                s = jnp.where(causal, s, _MASK_VALUE)

            m_prev = m_sc[h]                                       # (tq, 1)
            m_new = jnp.maximum(m_prev, jnp.max(s, axis=-1, keepdims=True))
            alpha = jnp.exp(m_prev - m_new)
            p = jnp.exp(s - m_new)                                 # (tq, tk) f32
            l_sc[h] = alpha * l_sc[h] + jnp.sum(p, axis=-1, keepdims=True)
            acc_sc[h] = alpha * acc_sc[h] + jnp.dot(
                p.astype(v_h.dtype), v_h, preferred_element_type=jnp.float32)
            m_sc[h] = m_new

        for_each_head(head_body)

    # Interior tiles (fully below the causal diagonal): no iota / compare / select.
    @pl.when(qi * tq >= ki * tk + tk - 1)
    def _unmasked():
        process(masked=False)

    # Diagonal tiles: apply the causal mask.  Tiles fully above the diagonal
    # (ki > last_ki) compute nothing, and (via the clamped K/V index maps in the
    # BlockSpecs) also DMA nothing.
    @pl.when(jnp.logical_and(ki <= last_ki, qi * tq < ki * tk + tk - 1))
    def _masked():
        process(masked=True)

    @pl.when(ki == last_ki)
    def _finalize():
        if unrolled:
            # Lane-dense single (tq, C) store.
            outs = [acc_sc[h] * pl.reciprocal(l_sc[h], approx=True)
                    for h in range(n_head)]
            o_ref[0] = jnp.concatenate(outs, axis=-1).astype(o_ref.dtype)
        else:
            def fin(h):
                inv = pl.reciprocal(l_sc[h], approx=True)
                o_ref[0, :, pl.ds(h * D, D)] = (acc_sc[h] * inv).astype(o_ref.dtype)

            for_each_head(fin)


def causal_attention(qkv, n_head, *, tq_pref=256, tk_pref=256):
    """qkv: (B, T, 3C) fused c_attn output (bf16) -> (B, T, C) attention output.

    Heads are split inside the kernel via lane slicing; no host-side head
    split/transpose of the activations is needed.
    """
    B, T, C3 = qkv.shape
    C = C3 // 3
    D = C // n_head
    tq = _pick_tile(T, tq_pref)
    tk = _pick_tile(T, tk_pref)

    def clamp(qi, ki):
        # Repeat the diagonal block index for fully-masked kv tiles so Pallas
        # skips their HBM->VMEM DMA entirely.
        return jnp.minimum(ki, (qi * tq + tq - 1) // tk)

    if C % 128 == 0:
        # Read q/k/v directly out of the fused qkv tensor: same array, three
        # block-index maps selecting the q / k / v column slab.
        q_in = k_in = v_in = qkv
        q_map = lambda b, qi, ki: (b, qi, 0)
        k_map = lambda b, qi, ki: (b, clamp(qi, ki), 1)
        v_map = lambda b, qi, ki: (b, clamp(qi, ki), 2)
    else:
        # Lane-alignment fallback for C not a multiple of 128: one slice copy,
        # still no head transposes.
        q_in, k_in, v_in = jnp.split(qkv, 3, axis=-1)
        q_map = lambda b, qi, ki: (b, qi, 0)
        k_map = lambda b, qi, ki: (b, clamp(qi, ki), 0)
        v_map = lambda b, qi, ki: (b, clamp(qi, ki), 0)

    kernel = functools.partial(_flash_attn_kernel, n_head=n_head)

    return pl.pallas_call(
        kernel,
        out_shape=jax.ShapeDtypeStruct((B, T, C), qkv.dtype),
        grid=(B, T // tq, T // tk),
        in_specs=[
            pl.BlockSpec((1, tq, C), q_map),
            pl.BlockSpec((1, tk, C), k_map),
            pl.BlockSpec((1, tk, C), v_map),
        ],
        out_specs=pl.BlockSpec((1, tq, C), lambda b, qi, ki: (b, qi, 0)),
        scratch_shapes=[
            pltpu.VMEM((n_head, tq, 1), jnp.float32),   # running max m
            pltpu.VMEM((n_head, tq, 1), jnp.float32),   # running denom l
            pltpu.VMEM((n_head, tq, D), jnp.float32),   # output accumulator
            pltpu.VMEM((n_head, tq, D), qkv.dtype),     # hoisted per-head q (bf16)
        ],
        compiler_params=pltpu.CompilerParams(
            dimension_semantics=("parallel", "parallel", "arbitrary"),
            vmem_limit_bytes=_VMEM_LIMIT,
        ),
    )(q_in, k_in, v_in)


# --------------------------------- Module forward ------------------------------------

def _prepare_params(params, n_embd, n_head):
    """Host-side one-time prep: fold 1/sqrt(D) into the q columns of c_attn
    (exact), store weights in bf16 (biases stay f32, they are tiny)."""
    D = n_embd // n_head
    scale = 1.0 / math.sqrt(D)
    w_attn = params["w_attn"].astype(jnp.float32).at[:, :n_embd].multiply(scale)
    b_attn = params["b_attn"].astype(jnp.float32).at[:n_embd].multiply(scale)
    return {
        "w_attn": w_attn.astype(jnp.bfloat16),
        "b_attn": b_attn,
        "w_proj": params["w_proj"].astype(jnp.bfloat16),
        "b_proj": params["b_proj"].astype(jnp.float32),
    }


def causal_self_attention(x, params, n_head):
    """Equivalent of CausalSelfAttention.forward. x: (B, T, C) -> (B, T, C).

    Intentional precision trade-off: all matmuls run with bf16 operands in HBM
    and on the MXU (f32 accumulation), unlike torch's f32 SDPA math.
    """
    B, T, C = x.shape
    p = _prepare_params(params, C, n_head)
    xb = x.astype(jnp.bfloat16)
    # qkv = self.c_attn(x)   (sm_scale pre-folded into the q columns)
    qkv = linear(xb.reshape(B * T, C), p["w_attn"], p["b_attn"])
    qkv = qkv.reshape(B, T, 3 * C)
    # y = scaled_dot_product_attention(q, k, v, is_causal=True), heads fused in-kernel.
    y = causal_attention(qkv, n_head)               # (B, T, C) bf16, no transposes
    # y = self.c_proj(y)
    y = linear(y.reshape(B * T, C), p["w_proj"], p["b_proj"])
    return y.reshape(B, T, C).astype(x.dtype)


# ------------------------------------ Reference ---------------------------------------

def _reference(x, params, n_head):
    B, T, C = x.shape
    D = C // n_head
    qkv = x @ params["w_attn"] + params["b_attn"]
    q, k, v = jnp.split(qkv, 3, axis=2)
    q = q.reshape(B, T, n_head, D).transpose(0, 2, 1, 3)
    k = k.reshape(B, T, n_head, D).transpose(0, 2, 1, 3)
    v = v.reshape(B, T, n_head, D).transpose(0, 2, 1, 3)
    s = jnp.einsum("bhqd,bhkd->bhqk", q, k) / math.sqrt(D)
    mask = jnp.tril(jnp.ones((T, T), dtype=bool))
    s = jnp.where(mask[None, None], s, -jnp.inf)
    p = jax.nn.softmax(s, axis=-1)
    y = jnp.einsum("bhqk,bhkd->bhqd", p, v)
    y = y.transpose(0, 2, 1, 3).reshape(B, T, C)
    return y @ params["w_proj"] + params["b_proj"]


# --------------------------------------- Main -----------------------------------------

if __name__ == "__main__":
    # Small config consistent with the module: n_embd % n_head == 0, T <= block_size.
    # D = 64 matches GPT-2's head_dim; T = 512 exercises multi-tile online softmax,
    # causal-tile DMA clamping, and the masked/unmasked tile split (2x2 kv tiles).
    B, T, C, H = 2, 512, 256, 4

    key = jax.random.PRNGKey(0)
    kx, k1, k2, k3, k4 = jax.random.split(key, 5)

    x = jax.random.normal(kx, (B, T, C), dtype=jnp.float32)

    # Deterministic parameter init (weights stored as (in, out) = torch weight.T).
    params = {
        "w_attn": jax.random.normal(k1, (C, 3 * C), dtype=jnp.float32) * 0.02,
        "b_attn": jax.random.normal(k2, (3 * C,), dtype=jnp.float32) * 0.02,
        "w_proj": jax.random.normal(k3, (C, C), dtype=jnp.float32) * 0.02,
        "b_proj": jax.random.normal(k4, (C,), dtype=jnp.float32) * 0.02,
    }

    y = causal_self_attention(x, params, n_head=H)
    y = jax.block_until_ready(y)

    y_ref = _reference(x, params, n_head=H)
    assert y.shape == (B, T, C)
    # Weights/activations are bf16 in HBM (f32 accumulation), so compare with a
    # tolerance appropriate for bf16 precision.
    assert jnp.allclose(y, y_ref, rtol=3e-2, atol=3e-2), "mismatch vs reference"

    print("KERNEL_OK")
</pallas_src>

<mosaic_0001>
module attributes {stable_mosaic.version = 11 : i64} {
  func.func @_linear_bias_kernel(%arg0: i32, %arg1: i32, %arg2: memref<512x256xbf16, #tpu.memory_space<vmem>>, %arg3: memref<256x256xbf16, #tpu.memory_space<vmem>>, %arg4: memref<1x256xf32, #tpu.memory_space<vmem>>, %arg5: memref<512x256xbf16, #tpu.memory_space<vmem>>) attributes {dimension_semantics = [#tpu.dimension_semantics<parallel>, #tpu.dimension_semantics<parallel>], iteration_bounds = array<i64: 2, 3>, scalar_prefetch = 0 : i64, scratch_operands = 0 : i64, tpu.core_type = #tpu.core_type<tc>, window_params = [{transform_indices = @transform_0, window_bounds = array<i64: 512, 256>}, {transform_indices = @transform_1, window_bounds = array<i64: 256, 256>}, {transform_indices = @transform_2, window_bounds = array<i64: 1, 256>}, {transform_indices = @transform_3, window_bounds = array<i64: 512, 256>}]} {
    %c0 = arith.constant 0 : index
    %c0_0 = arith.constant 0 : index
    %0 = vector.load %arg2[%c0, %c0_0] : memref<512x256xbf16, #tpu.memory_space<vmem>>, vector<512x256xbf16>
    %c0_1 = arith.constant 0 : index
    %c0_2 = arith.constant 0 : index
    %1 = vector.load %arg3[%c0_1, %c0_2] : memref<256x256xbf16, #tpu.memory_space<vmem>>, vector<256x256xbf16>
    %cst = arith.constant dense<0.000000e+00> : vector<512x256xf32>
    %2 = tpu.matmul %0, %1, %cst {dimension_numbers = #tpu.dot_dimension_numbers<[1], [0], [0], [1], [0, 0, 1, 1], [], []>} : vector<512x256xbf16>, vector<256x256xbf16>, vector<512x256xf32> -> vector<512x256xf32>
    %c0_3 = arith.constant 0 : index
    %c0_4 = arith.constant 0 : index
    %3 = vector.load %arg4[%c0_3, %c0_4] : memref<1x256xf32, #tpu.memory_space<vmem>>, vector<1x256xf32>
    %4 = vector.broadcast %3 : vector<1x256xf32> to vector<512x256xf32>
    %5 = arith.addf %2, %4 : vector<512x256xf32>
    %6 = arith.truncf %5 : vector<512x256xf32> to vector<512x256xbf16>
    %c0_5 = arith.constant 0 : index
    %c0_6 = arith.constant 0 : index
    %7 = vector.load %arg5[%c0_5, %c0_6] : memref<512x256xbf16, #tpu.memory_space<vmem>>, vector<512x256xbf16>
    tpu.vector_store %arg5[%c0_5, %c0_6], %6 {strides = array<i32>} : memref<512x256xbf16, #tpu.memory_space<vmem>>, vector<512x256xbf16>,
    return
  }
  func.func @transform_0(%arg0: i32, %arg1: i32) -> (i32, i32) {
    %c0_i32 = arith.constant 0 : i32
    %c0_i32_0 = arith.constant 0 : i32
    return %arg0, %c0_i32 : i32, i32
  }
  func.func @transform_1(%arg0: i32, %arg1: i32) -> (i32, i32) {
    %c0_i32 = arith.constant 0 : i32
    %c0_i32_0 = arith.constant 0 : i32
    return %c0_i32, %arg1 : i32, i32
  }
  func.func @transform_2(%arg0: i32, %arg1: i32) -> (i32, i32) {
    %c0_i32 = arith.constant 0 : i32
    %c0_i32_0 = arith.constant 0 : i32
    return %c0_i32, %arg1 : i32, i32
  }
  func.func @transform_3(%arg0: i32, %arg1: i32) -> (i32, i32) {
    %c0_i32 = arith.constant 0 : i32
    return %arg0, %arg1 : i32, i32
  }
}

</mosaic_0001>

<bundles_post_ra>
// kernel: tpu_custom_call.1
= control target key start
LH: loop header
LB: loop body
LE: loop exit
PB: predicated region body
PF: predicated region fallthrough
CT: control target
= control target key end

     0   :  { %s3360_s0 = inlined_call_operand.hbm [shape: bf16[1024,256], index: 0, kind: input, shape index: {}]   ;;  %s3361_s1 = inlined_call_operand.hbm [shape: bf16[256,768], index: 1, kind: input, shape index: {}]   ;;  %s3362_s2 = inlined_call_operand.hbm [shape: f32[1,768], index: 2, kind: input, shape index: {}]   ;;  %s3363_s3 = inlined_call_operand.hbm [shape: bf16[1024,768], index: 3, kind: output, shape index: {}]  }
   0x1   :  { %3381 = sst [smem:[#allocation24_spill]] %s3361_s1 }
   0x2   :  { %3382 = sst [smem:[#allocation25_spill]] %s3363_s3 }
   0x3   :  { %8 = vsyncpa [#allocation3], 0 }
   0x4   :  { %10 = vsyncpa [#allocation3 + $0x1], 0 }
   0x5   :  { %11 = vsyncpa [#allocation6], 0 }
   0x6   :  { %13 = vsyncpa [#allocation6 + $0x1], 0 }
   0x7   :  { %14 = vsyncpa [#allocation4], 0 }
   0x8   :  { %16 = vsyncpa [#allocation4 + $0x1], 0  ;;  %s2665_s12 = smov 0   ;;  %s2667_s13 = smov 0  }
   0x9   :  { %s2669_s14 = smov 0   ;;  %s2671_s15 = smov 0  }
   0xa   :  { %s2673_s16 = smov 0   ;;  %s2675_s17 = smov 0  }
   0xb   :  { %s2677_s18 = smov 0   ;;  %s2679_s19 = smov 0  }
   0xc   :  { %s2681_s20 = smov 0   ;;  %s2683_s21 = smov 0  }
   0xd   :  { %s2685_s22 = smov 0   ;;  %s2687_s23 = smov 0  }
   0xe   :  { %s2689_s24 = smov 0   ;;  %s2691_s25 = smov 0  }
   0xf LB: > { %3383 = sst [smem:[#allocation12_spill]] %s2589_s14  ;;  %s31_s26 = sadd.s32 1, %s2625_s23  ;;  %s2633_s25 = sphi %s2691_s25, %s22_s25   ;;  %s2629_s24 = sphi %s2689_s24, %s3434_s24   ;;  %s2625_s23 = sphi %s2687_s23, %s3442_s23   ;;  %s2621_s22 = sphi %s2685_s22, %s3432_s22   ;;  %s2617_s21 = sphi %s2683_s21, %s3441_s21   ;;  %s2613_s20 = sphi %s2681_s20, %s3430_s20   ;;  %s2609_s19 = sphi %s2679_s19, %s3440_s19   ;;  %s2605_s18 = sphi %s2677_s18, %s3439_s18   ;;  %s2601_s17 = sphi %s2675_s17, %s3428_s17   ;;  %s2597_s16 = sphi %s2673_s16, %s3438_s16   ;;  %s2593_s15 = sphi %s2671_s15, %s3437_s15   ;;  %s2589_s14 = sphi %s2669_s14, %s3426_s14   ;;  %s2585_s13 = sphi %s2667_s13, %s3436_s13   ;;  %s2581_s12 = sphi %s2665_s12, %s3435_s12  }
  0x10   : > { %3384 = sst [smem:[#allocation13_spill]] %s2601_s17  ;;  %p3366_p0 = scmp.eq.s32.totalorder %s2633_s25, 0 }
  0x11   : > { %3385 = sst [smem:[#allocation14_spill]] %s2613_s20  ;;  %p2739_p1 = scmp.ge.s32.totalorder %s31_s26, 3 }
  0x12   : > { %3386 = sst [smem:[#allocation15_spill]] %s2617_s21  ;;  %p74_p2 = scmp.ne.s32.totalorder %s2601_s17, %s2597_s16 }
  0x13   : > { %3387 = sst [smem:[#allocation16_spill]] %s2621_s22  ;;  %p3365_p4 = scmp.lt.s32.totalorder %s2633_s25, 6 }
  0x14   : > { %3388 = sst [smem:[#allocation17_spill]] %s2625_s23  ;;  %p76_p5 = por %p74_p2, %p3366_p0 }
  0x15   : > { %3389 = sst [smem:[#allocation18_spill]] %s2629_s24  ;;  %s180_s29 = sand.u32 1, %s2633_s25  }
  0x16   : > { %s3364_s30 = sand.u32 1, %s2601_s17   ;;  %s2008_s5 = sshll.u32 %s2625_s23, 7 }
  0x17   : > { %s1828_s4 = sshll.u32 %s3364_s30, 8  ;;  %s3391_s1 = sld [smem:[#allocation24_spill]] }
  0x18   : > { %s184_s9 = scalar_lea.vmem [#allocation5], %s1828_s4  ;;  %p2763_p6 = pnand %p3365_p4, %p76_p5 }
  0x19   : > { %s191_s10 = sshll.u32 %s184_s9, 4  ;;  %s2770_s30 = scalar_lea.sflag [#allocation6], %s180_s29  ;;  %s2767_s10 = int_to_ptr.vmem [resolvable:$true] %s191_s10 }
  0x1a   : > { %p3377_p9 = pneg %p2763_p6 }
  0x1d   : > { %s2759_s8 = scalar_lea.hbm %s3391_s1, %s2008_s5  ;;  %s2398_s7 = scalar_lea.hbm %s3391_s1, 12288 }
  0x1e   : > { %s2393_s5 = scalar_lea.hbm %s2759_s8, 4096  ;;  %p2399_p12 = scmp.lt.u32.totalorder %s2759_s8, %s3391_s1 }
  0x1f   : > { %p2394_p8 = scmp.ne.s32.totalorder %s2759_s8, %s2393_s5  ;;  %p2400_p13 = scmp.lt.u32.totalorder %s2398_s7, %s2393_s5 }
  0x20   : > { %p2402_p5 = scmp.lt.u32.totalorder %s2393_s5, %s2759_s8 }
  0x21   : > { %p2396_p10 = pnand %p3377_p9, %p2394_p8  ;;  %p2401_p2 = por %p2400_p13, %p2399_p12 }
  0x23   : > { %p2397_p11 = pneg %p2396_p10  ;;  %p2403_p4 = por %p2402_p5, %p2401_p2 }
  0x25   : > { %p2404_p3 = pnand %p2403_p4, %p2397_p11 }
  0x27   : > { %2407 = shalt.err (!%p2404_p3)
}
  0x28   : > { %s2408_s29 = scalar_lea.vmem %s2767_s10, 4096  ;;  %s2635_s4 = smov [#allocation5]  }
  0x29   : > { %p2409_p8 = scmp.ne.s32.totalorder %s2767_s10, %s2408_s29  ;;  %s2413_s6 = sshll.u32 %s2635_s4, 4  ;;  %s2414_s6 = int_to_ptr.vmem [resolvable:$false] %s2413_s6 }
  0x2a   : > { %s2415_s28 = scalar_lea.vmem %s2414_s6, 8192  ;;  %p2416_p7 = scmp.lt.s32.totalorder %s2767_s10, %s2414_s6 }
  0x2b   : > { %p2411_p10 = pnand %p2409_p8, %p3377_p9  ;;  %p2417_p12 = scmp.lt.s32.totalorder %s2415_s28, %s2408_s29 }
  0x2d   : > { %p2412_p0 = pneg %p2411_p10  ;;  %p2418_p13 = por %p2417_p12, %p2416_p7 }
  0x2f   : > { %p2419_p2 = pnand %p2418_p13, %p2412_p0 }
  0x31   : > { %2422 = shalt.err (!%p2419_p2)
}
  0x32   : > { %s2636_s5 = smov 384   ;;  %s3367_s7 = smov 128  }
  0x33   : > { %s3368_s9 = smov 8   ;;  %p218_p0 = scmp.lt.s32.totalorder %s2633_s25, 7 }
  0x34   : > { %2121 = dma.hbm_to_vmem [thread:$0]  (!%p2763_p6), %s2759_s8, 4096, %s2767_s10, %s2770_s30, %s2636_s5, %s3367_s7, %s3368_s9  }
  0x35   : > { %p3393_p3 = scmp.ge.s32.totalorder %s2633_s25, 1  ;;  %s2808_s4 = sadd.s32 4294967295, %s2633_s25  }
  0x36   : > { %s1821_s6 = sadd.s32 4294967294, %s2633_s25   ;;  %s3444_s26 = smov (%p2739_p1, %s31_s26), 0 }
  0x37   : > { %p2803_p4 = pnand %p3393_p3, %p218_p0  ;;  %3395 = sst [smem:[#allocation19_spill]] %s3444_s26 }
  0x38   : > { %s34_s28 = sadd.s32 1, %s2629_s24  ;;  %s41_s8 = sadd.s32 1, %s2613_s20 }
  0x39   : > { %s3394_s29 = scalar_select %p2803_p4, 1, 0 }
  0x3a   : > { %s3446_s28 = smov (!%p2739_p1, %s34_s28), %s2629_s24  ;;  %p48_p7 = scmp.ne.s32.totalorder %s2613_s20, %s2609_s19 }
  0x3b   : > { %p54_p11 = scmp.ne.s32.totalorder %s2609_s19, %s2605_s18  ;;  %p36_p5 = scmp.ge.s32.totalorder %s3446_s28, 2 }
  0x3c   : > { %p55_p8 = scmp.eq.s32.totalorder %s2808_s4, 0  ;;  %p3396_p10 = scmp.eq.s32.totalorder %s2633_s25, 0 }
  0x3d   : > { %s64_s5 = ssub.s32 %s2625_s23, %s3444_s26  ;;  %s3448_s28 = smov (%p36_p5, %s3446_s28), 0 }
  0x3e   : > { %p2829_p12 = por %p3396_p10, %p48_p7  ;;  %3398 = sst [smem:[#allocation20_spill]] %s3448_s28 }
  0x3f   : > { %p2837_p1 = por %p55_p8, %p54_p11  ;;  %p65_p13 = scmp.eq.s32.totalorder %s64_s5, 0 }
  0x40   : > { %s38_s18 = ssub.s32 %s2629_s24, %s3448_s28  ;;  %p3400_p2 = scmp.ne.s32.totalorder %s2597_s16, %s2593_s15 }
  0x41   : > { %s3399_s27 = scalar_select %p2837_p1, 1, 0 }
  0x42   : > { %p2846_p0 = por %p3400_p2, %p55_p8  ;;  %p39_p3 = scmp.eq.s32.totalorder %s38_s18, 0 }
  0x43   : > { %s118_s9 = sor.u32 %s64_s5, %s38_s18  ;;  %s3402_s1 = sadd.s32 1, %s2601_s17 }
  0x44   : > { %s3401_s7 = scalar_select %p2846_p0, 1, 0 }
  0x45   : > { %s2853_s26 = scalar_select %p65_p13, %s2601_s17, %s3402_s1  }
  0x46   : > { %s2856_s3 = scalar_select %p39_p3, %s2613_s20, %s41_s8  }
  0x47   : > { %3403 = sst [smem:[#allocation21_spill]] %s2853_s26  ;;  %p119_p7 = scmp.eq.s32.totalorder %s118_s9, 0 }
  0x48   : > { %3404 = sst [smem:[#allocation22_spill]] %s2856_s3  ;;  %s121_s21 = sadd.s32 1, %s2589_s14 }
  0x49   : > { %p131_p11 = scmp.ne.s32.totalorder %s2589_s14, %s2585_s13  ;;  %p132_p5 = scmp.eq.s32.totalorder %s2808_s4, 5 }
  0x4a   : > { %s2863_s15 = scalar_select %p119_p7, %s2589_s14, %s121_s21  }
  0x4b   : > { %p2865_p8 = por %p132_p5, %p131_p11  ;;  %p137_p10 = scmp.ne.s32.totalorder %s2585_s13, %s2581_s12 }
  0x4c   : > { %3405 = sst [smem:[#allocation23_spill]] %s2863_s15  ;;  %p138_p2 = scmp.eq.s32.totalorder %s1821_s6, 5 }
  0x4d   : > { %s3406_s28 = scalar_select %p2865_p8, 1, 0 }
  0x4e   : > { %s158_s1 = sand.u32 1, %s2613_s20   ;;  %p2872_p13 = por %p138_p2, %p137_p10 }
  0x4f   : > { %s1824_s5 = sshll.u32 %s158_s1, 9  ;;  %s2007_s9 = sshll.u32 %s2629_s24, 13 }
  0x50   : > { %s3407_s8 = scalar_select %p2872_p13, 1, 0 }
  0x51   : > { %s162_s18 = scalar_lea.vmem [#allocation2], %s1824_s5  ;;  %s2880_s21 = scalar_lea.hbm %s3360_s0, %s2007_s9 }
  0x52   : > { %s170_s3 = sshll.u32 %s162_s18, 4  ;;  %p3408_p3 = scmp.lt.s32.totalorder %s2633_s25, 6  ;;  %s2882_s3 = int_to_ptr.vmem [resolvable:$true] %s170_s3 }
  0x53   : > { %s3410_s24 = sand.u32 1, %s2601_s17   ;;  %s2009_s22 = sshll.u32 %s2625_s23, 5 }
  0x54   : > { %p2888_p7 = pnand %p3408_p3, %p2829_p12  ;;  %s2894_s5 = sshll.u32 %s3410_s24, 1 }
  0x55   : > { %s2900_s18 = scalar_lea.hbm %s3362_s2, %s2009_s22  ;;  %s2902_s20 = scalar_lea.sflag [#allocation3], %s158_s1 }
  0x56   : > { %s2423_s15 = scalar_lea.hbm %s2880_s21, 8192  ;;  %p2425_p12 = pneg %p2888_p7 }
  0x57   : > { %p2424_p11 = scmp.ne.s32.totalorder %s2880_s21, %s2423_s15  ;;  %s2428_s24 = scalar_lea.hbm %s3360_s0, 16384 }
  0x58   : > { %p2429_p2 = scmp.lt.u32.totalorder %s2880_s21, %s3360_s0  ;;  %p2430_p3 = scmp.lt.u32.totalorder %s2428_s24, %s2423_s15 }
  0x59   : > { %p2426_p5 = pnand %p2425_p12, %p2424_p11  ;;  %p2432_p13 = scmp.lt.u32.totalorder %s2423_s15, %s2880_s21 }
  0x5a   : > { %p2431_p9 = por %p2430_p3, %p2429_p2 }
  0x5b   : > { %p2427_p10 = pneg %p2426_p5 }
  0x5c   : > { %p2433_p8 = por %p2432_p13, %p2431_p9 }
  0x5e   : > { %p2434_p0 = pnand %p2433_p8, %p2427_p10 }
  0x60   : > { %2437 = shalt.err (!%p2434_p0)
}
  0x61   : > { %s2438_s1 = scalar_lea.vmem %s2882_s3, 8192  ;;  %s2639_s17 = smov [#allocation2]  }
  0x62   : > { %p2439_p11 = scmp.ne.s32.totalorder %s2882_s3, %s2438_s1  ;;  %s2443_s22 = sshll.u32 %s2639_s17, 4  ;;  %s2444_s22 = int_to_ptr.vmem [resolvable:$false] %s2443_s22 }
  0x63   : > { %s2445_s14 = scalar_lea.vmem %s2444_s22, 16384  ;;  %p2446_p4 = scmp.lt.s32.totalorder %s2882_s3, %s2444_s22 }
  0x64   : > { %p2441_p5 = pnand %p2439_p11, %p2425_p12  ;;  %p2447_p2 = scmp.lt.s32.totalorder %s2445_s14, %s2438_s1 }
  0x66   : > { %p2442_p1 = pneg %p2441_p5  ;;  %p2448_p3 = por %p2447_p2, %p2446_p4 }
  0x68   : > { %p2449_p9 = pnand %p2448_p3, %p2442_p1 }
  0x6a   : > { %2452 = shalt.err (!%p2449_p9)
}
  0x6b   : > { %s3411_s23 = smov 8   ;;  %s3412_s15 = smov 128  }
  0x6c   : > { %2118 = dma.hbm_to_vmem [thread:$0]  (!%p2888_p7), %s2880_s21, 8192, %s2882_s3, %s2902_s20, %s3412_s15, %s3412_s15, %s3411_s23  }
  0x6d   : > { %s205_s26 = scalar_lea.vmem [#allocation7], %s2894_s5  ;;  %s2453_s10 = scalar_lea.hbm %s2900_s18, 32 }
  0x6e   : > { %s213_s9 = sshll.u32 %s205_s26, 4  ;;  %p2454_p4 = scmp.ne.s32.totalorder %s2900_s18, %s2453_s10  ;;  %s214_s9 = int_to_ptr.vmem [resolvable:$true] %s213_s9 }
  0x6f   : > { %p3413_p1 = pneg %p2763_p6  ;;  %s2458_s1 = scalar_lea.hbm %s3362_s2, 96 }
  0x70   : > { %p2459_p13 = scmp.lt.u32.totalorder %s2900_s18, %s3362_s2  ;;  %p2460_p12 = scmp.lt.u32.totalorder %s2458_s1, %s2453_s10 }
  0x71   : > { %p2456_p0 = pnand %p2454_p4, %p3413_p1  ;;  %p2462_p7 = scmp.lt.u32.totalorder %s2453_s10, %s2900_s18 }
  0x72   : > { %p2461_p10 = por %p2460_p12, %p2459_p13 }
  0x73   : > { %p2457_p8 = pneg %p2456_p0 }
  0x74   : > { %p2463_p11 = por %p2462_p7, %p2461_p10 }
  0x76   : > { %p2464_p5 = pnand %p2463_p11, %p2457_p8 }
  0x78   : > { %2467 = shalt.err (!%p2464_p5)
}
  0x79   : > { %s2468_s3 = scalar_lea.vmem %s214_s9, 32  ;;  %p3414_p3 = pmov %p3413_p1 }
  0x7a   : > { %p2469_p2 = scmp.ne.s32.totalorder %s214_s9, %s2468_s3  ;;  %s2640_s20 = smov [#allocation7]  }
  0x7b   : > { %s2473_s21 = sshll.u32 %s2640_s20, 4  ;;  %s2474_s21 = int_to_ptr.vmem [resolvable:$false] %s2473_s21 }
  0x7c   : > { %p2471_p9 = pnand %p2469_p2, %p3414_p3  ;;  %s2475_s5 = scalar_lea.vmem %s2474_s21, 64 }
  0x7d   : > { %p2476_p1 = scmp.lt.s32.totalorder %s214_s9, %s2474_s21  ;;  %p2477_p0 = scmp.lt.s32.totalorder %s2475_s5, %s2468_s3 }
  0x7e   : > { %p2472_p4 = pneg %p2471_p9 }
  0x7f   : > { %p2478_p12 = por %p2477_p0, %p2476_p1 }
  0x81   : > { %p2479_p13 = pnand %p2478_p12, %p2472_p4 }
  0x83   : > { %2482 = shalt.err (!%p2479_p13)
}
  0x84   : > { %2124 = dma.hbm_to_vmem [thread:$0]  (!%p2763_p6), %s2900_s18, 32, %s214_s9, %s2770_s30  }
  0x85   : > { %p3415_p8 = scmp.ne.s32.totalorder %s3394_s29, 0 }
  0x86   : > { %s224_s14 = sand.u32 (!%p3415_p8), 1, %s2609_s19   ;;  %p3416_p10 = scmp.ne.s32.totalorder (!%p3415_p8), %s3399_s27, 0 }
  0x87   : > { %222 = sbr.rel (%p3415_p8) target bundleno = 568 (0x238), region = 32  ;;  %s1835_s23 = sshll.u32 (!%p3415_p8), %s224_s14, 9 }
  0x88   : > { %s225_s15 = scalar_lea.sflag (!%p3415_p8), [#allocation3], %s224_s14  ;;  %s2957_s26 = scalar_lea.vmem (!%p3415_p8), [#allocation2], %s1835_s23 }
  0x8e   : > { %2568 = dma.done.wait (%p3416_p10), %s225_s15, 8192  }
  0x8f   : > { %2570 = vsyncadd (%p3416_p10), %s225_s15, 4294959104  ;;  %s233_s30 = sand.u32 1, %s2808_s4   ;;  %s235_s11 = sand.u32 1, %s2597_s16  }
  0x90   : > { %s1836_s29 = sshll.u32 %s235_s11, 8  ;;  %s234_s18 = scalar_lea.sflag [#allocation6], %s233_s30 }
  0x91   : > { %s2967_s9 = scalar_lea.vmem [#allocation5], %s1836_s29  ;;  %p3417_p6 = scmp.ne.s32.totalorder %s3401_s7, 0 }
  0x93   : > { %2572 = dma.done.wait (%p3417_p6), %s234_s18, 4128  }
  0x94   : > { %2574 = vsyncadd (%p3417_p6), %s234_s18, 4294963168  ;;  %v2249_v0 = vld [vmem:[%s2967_s9 + $0x4] ss:$8 sps:$4 sm:$0xff]   ;;  %v2251_v1 = vld [vmem:[%s2967_s9] ss:$8 sps:$4 sm:$0xff]   ;;  %s1837_s7 = sshll.u32 %s235_s11, 1 }
  0x95   : > { %872 = vmatprep.subr.bf16.mxu0 %v2249_v0  ;;  %2074 = vmatprep.subr.bf16.mxu1 %v2249_v0  ;;  %v2252_v2 = vld [vmem:[%s2967_s9 + $0x14] ss:$8 sps:$4 sm:$0xff]   ;;  %v2254_v3 = vld [vmem:[%s2967_s9 + $0x10] ss:$8 sps:$4 sm:$0xff]   ;;  %v2255_v4 = vld [vmem:[%s2967_s9 + $0x24] ss:$8 sps:$4 sm:$0xff]  }
  0x96   : > { %873 = vmatpush1.bf16.msra.mxu0 %v2251_v1  ;;  %2090 = vmatpush1.bf16.msra.mxu1 %v2251_v1  ;;  %v2257_v5 = vld [vmem:[%s2967_s9 + $0x20] ss:$8 sps:$4 sm:$0xff]   ;;  %v2258_v6 = vld [vmem:[%s2967_s9 + $0x34] ss:$8 sps:$4 sm:$0xff]   ;;  %v2260_v7 = vld [vmem:[%s2967_s9 + $0x30] ss:$8 sps:$4 sm:$0xff]  }
  0x97   : > { %874 = vmatprep.subr.bf16.mxu0 %v2252_v2  ;;  %2075 = vmatprep.subr.bf16.mxu1 %v2252_v2  ;;  %v2261_v8 = vld [vmem:[%s2967_s9 + $0x44] ss:$8 sps:$4 sm:$0xff]   ;;  %v2263_v9 = vld [vmem:[%s2967_s9 + $0x40] ss:$8 sps:$4 sm:$0xff]   ;;  %v2264_v10 = vld [vmem:[%s2967_s9 + $0x54] ss:$8 sps:$4 sm:$0xff]  }
  0x98   : > { %v2266_v11 = vld [vmem:[%s2967_s9 + $0x50] ss:$8 sps:$4 sm:$0xff]   ;;  %v2267_v12 = vld [vmem:[%s2967_s9 + $0x64] ss:$8 sps:$4 sm:$0xff]   ;;  %v2269_v14 = vld [vmem:[%s2967_s9 + $0x60] ss:$8 sps:$4 sm:$0xff]  }
  0x99   : > { %v2299_v13 = vld [vmem:[%s2957_s26 + $0x4] ss:$8 sps:$4 sm:$0xff]   ;;  %v2270_v16 = vld [vmem:[%s2967_s9 + $0x74] ss:$8 sps:$4 sm:$0xff]   ;;  %v2272_v17 = vld [vmem:[%s2967_s9 + $0x70] ss:$8 sps:$4 sm:$0xff]  }
  0x9a   : > { %875 = vmatpush1.bf16.msra.mxu0 %v2254_v3  ;;  %2091 = vmatpush1.bf16.msra.mxu1 %v2254_v3  ;;  %v2302_v15 = vld [vmem:[%s2957_s26 + $0x104] ss:$8 sps:$4 sm:$0xff]   ;;  %v2275_v19 = vld [vmem:[%s2967_s9 + $0x80] ss:$8 sps:$4 sm:$0xff]   ;;  %v2276_v20 = vld [vmem:[%s2967_s9 + $0x94] ss:$8 sps:$4 sm:$0xff]  }
  0x9b   : > { %876 = vmatprep.subr.bf16.mxu0 %v2255_v4  ;;  %2076 = vmatprep.subr.bf16.mxu1 %v2255_v4  ;;  %v2273_v18 = vld [vmem:[%s2967_s9 + $0x84] ss:$8 sps:$4 sm:$0xff]   ;;  %v2278_v21 = vld [vmem:[%s2967_s9 + $0x90] ss:$8 sps:$4 sm:$0xff]   ;;  %v2281_v23 = vld [vmem:[%s2967_s9 + $0xa0] ss:$8 sps:$4 sm:$0xff]  }
  0x9c   : > { %904 = vmatprep.mubr.bf16.mxu0 %v2299_v13  ;;  %1064 = vmatprep.mubr.bf16.mxu1 %v2302_v15  ;;  %v2279_v22 = vld [vmem:[%s2967_s9 + $0xa4] ss:$8 sps:$4 sm:$0xff]   ;;  %v2282_v24 = vld [vmem:[%s2967_s9 + $0xb4] ss:$8 sps:$4 sm:$0xff]   ;;  %v2284_v25 = vld [vmem:[%s2967_s9 + $0xb0] ss:$8 sps:$4 sm:$0xff]  }
  0x9d   : > { %v2285_v26 = vld [vmem:[%s2967_s9 + $0xc4] ss:$8 sps:$4 sm:$0xff]   ;;  %v2287_v27 = vld [vmem:[%s2967_s9 + $0xc0] ss:$8 sps:$4 sm:$0xff]   ;;  %v2288_v28 = vld [vmem:[%s2967_s9 + $0xd4] ss:$8 sps:$4 sm:$0xff]  }
  0x9e   : > { %877 = vmatpush1.bf16.msra.mxu0 %v2257_v5  ;;  %2092 = vmatpush1.bf16.msra.mxu1 %v2257_v5  ;;  %v2290_v29 = vld [vmem:[%s2967_s9 + $0xd0] ss:$8 sps:$4 sm:$0xff]   ;;  %v2291_v30 = vld [vmem:[%s2967_s9 + $0xe4] ss:$8 sps:$4 sm:$0xff]   ;;  %v2293_v31 = vld [vmem:[%s2967_s9 + $0xe0] ss:$8 sps:$4 sm:$0xff]  }
  0x9f   : > { %878 = vmatprep.subr.bf16.mxu0 %v2258_v6  ;;  %2077 = vmatprep.subr.bf16.mxu1 %v2258_v6  ;;  %v2294_v32 = vld [vmem:[%s2967_s9 + $0xf4] ss:$8 sps:$4 sm:$0xff]   ;;  %v2296_v33 = vld [vmem:[%s2967_s9 + $0xf0] ss:$8 sps:$4 sm:$0xff]   ;;  %v2297_v34 = vld [vmem:[%s2957_s26] ss:$8 sps:$4 sm:$0xff]  }
  0xa0   : > { %v2300_v35 = vld [vmem:[%s2957_s26 + $0x100] ss:$8 sps:$4 sm:$0xff]   ;;  %v2303_v36 = vld [vmem:[%s2957_s26 + $0x14] ss:$8 sps:$4 sm:$0xff]   ;;  %v2307_v38 = vld [vmem:[%s2957_s26 + $0x10] ss:$8 sps:$4 sm:$0xff]  }
  0xa1   : > { %v2305_v37 = vld [vmem:[%s2957_s26 + $0x114] ss:$8 sps:$4 sm:$0xff]   ;;  %v2308_v39 = vld [vmem:[%s2957_s26 + $0x110] ss:$8 sps:$4 sm:$0xff]   ;;  %v2309_v40 = vld [vmem:[%s2957_s26 + $0x24] ss:$8 sps:$4 sm:$0xff]  }
  0xa2   : > { %879 = vmatpush1.bf16.msra.mxu0 %v2260_v7  ;;  %2093 = vmatpush1.bf16.msra.mxu1 %v2260_v7  ;;  %v2311_v41 = vld [vmem:[%s2957_s26 + $0x124] ss:$8 sps:$4 sm:$0xff]   ;;  %v2313_v42 = vld [vmem:[%s2957_s26 + $0x20] ss:$8 sps:$4 sm:$0xff]   ;;  %v2315_v44 = vld [vmem:[%s2957_s26 + $0x34] ss:$8 sps:$4 sm:$0xff]  }
  0xa3   : > { %880 = vmatprep.subr.bf16.mxu0 %v2261_v8  ;;  %2078 = vmatprep.subr.bf16.mxu1 %v2261_v8  ;;  %v2314_v43 = vld [vmem:[%s2957_s26 + $0x120] ss:$8 sps:$4 sm:$0xff]   ;;  %v2317_v45 = vld [vmem:[%s2957_s26 + $0x134] ss:$8 sps:$4 sm:$0xff]   ;;  %v2319_v46 = vld [vmem:[%s2957_s26 + $0x30] ss:$8 sps:$4 sm:$0xff]  }
  0xa4   : > { %v2320_v47 = vld [vmem:[%s2957_s26 + $0x130] ss:$8 sps:$4 sm:$0xff]   ;;  %v2321_v48 = vld [vmem:[%s2957_s26 + $0x44] ss:$8 sps:$4 sm:$0xff]   ;;  %v2325_v50 = vld [vmem:[%s2957_s26 + $0x40] ss:$8 sps:$4 sm:$0xff]  }
  0xa5   : > { %v2323_v49 = vld [vmem:[%s2957_s26 + $0x144] ss:$8 sps:$4 sm:$0xff]   ;;  %v2326_v51 = vld [vmem:[%s2957_s26 + $0x140] ss:$8 sps:$4 sm:$0xff]   ;;  %v2327_v52 = vld [vmem:[%s2957_s26 + $0x54] ss:$8 sps:$4 sm:$0xff]  }
  0xa6   : > { %881 = vmatpush1.bf16.msra.mxu0 %v2263_v9  ;;  %2094 = vmatpush1.bf16.msra.mxu1 %v2263_v9  ;;  %v2329_v53 = vld [vmem:[%s2957_s26 + $0x154] ss:$8 sps:$4 sm:$0xff]   ;;  %v2331_v54 = vld [vmem:[%s2957_s26 + $0x50] ss:$8 sps:$4 sm:$0xff]   ;;  %v2333_v56 = vld [vmem:[%s2957_s26 + $0x64] ss:$8 sps:$4 sm:$0xff]  }
  0xa7   : > { %882 = vmatprep.subr.bf16.mxu0 %v2264_v10  ;;  %2079 = vmatprep.subr.bf16.mxu1 %v2264_v10  ;;  %v2332_v55 = vld [vmem:[%s2957_s26 + $0x150] ss:$8 sps:$4 sm:$0xff]   ;;  %v2335_v57 = vld [vmem:[%s2957_s26 + $0x164] ss:$8 sps:$4 sm:$0xff]   ;;  %v2337_v58 = vld [vmem:[%s2957_s26 + $0x60] ss:$8 sps:$4 sm:$0xff]  }
  0xa8   : > { %v2338_v59 = vld [vmem:[%s2957_s26 + $0x160] ss:$8 sps:$4 sm:$0xff]   ;;  %v2339_v60 = vld [vmem:[%s2957_s26 + $0x74] ss:$8 sps:$4 sm:$0xff]   ;;  %v2343_v62 = vld [vmem:[%s2957_s26 + $0x70] ss:$8 sps:$4 sm:$0xff]  }
  0xa9   : > { %v2341_v61 = vld [vmem:[%s2957_s26 + $0x174] ss:$8 sps:$4 sm:$0xff]   ;;  %v2344_v63 = vld [vmem:[%s2957_s26 + $0x170] ss:$8 sps:$4 sm:$0xff]   ;;  %v2345_v0 = vld [vmem:[%s2957_s26 + $0x84] ss:$8 sps:$4 sm:$0xff]  }
  0xaa   : > { %883 = vmatpush1.bf16.msra.mxu0 %v2266_v11  ;;  %2095 = vmatpush1.bf16.msra.mxu1 %v2266_v11  ;;  %v2347_v1 = vld [vmem:[%s2957_s26 + $0x184] ss:$8 sps:$4 sm:$0xff]   ;;  %v2349_v2 = vld [vmem:[%s2957_s26 + $0x80] ss:$8 sps:$4 sm:$0xff]   ;;  %v2351_v4 = vld [vmem:[%s2957_s26 + $0x94] ss:$8 sps:$4 sm:$0xff]  }
  0xab   : > { %884 = vmatprep.subr.bf16.mxu0 %v2267_v12  ;;  %2080 = vmatprep.subr.bf16.mxu1 %v2267_v12  ;;  %v2350_v3 = vld [vmem:[%s2957_s26 + $0x180] ss:$8 sps:$4 sm:$0xff]   ;;  %v2353_v5 = vld [vmem:[%s2957_s26 + $0x194] ss:$8 sps:$4 sm:$0xff]   ;;  %v2355_v6 = vld [vmem:[%s2957_s26 + $0x90] ss:$8 sps:$4 sm:$0xff]  }
  0xac   : > { %v2356_v7 = vld [vmem:[%s2957_s26 + $0x190] ss:$8 sps:$4 sm:$0xff]   ;;  %v2357_v8 = vld [vmem:[%s2957_s26 + $0xa4] ss:$8 sps:$4 sm:$0xff]   ;;  %v2361_v10 = vld [vmem:[%s2957_s26 + $0xa0] ss:$8 sps:$4 sm:$0xff]  }
  0xad   : > { %v2359_v9 = vld [vmem:[%s2957_s26 + $0x1a4] ss:$8 sps:$4 sm:$0xff]   ;;  %v2362_v11 = vld [vmem:[%s2957_s26 + $0x1a0] ss:$8 sps:$4 sm:$0xff]   ;;  %v2363_v12 = vld [vmem:[%s2957_s26 + $0xb4] ss:$8 sps:$4 sm:$0xff]  }
  0xae   : > { %885 = vmatpush1.bf16.msra.mxu0 %v2269_v14  ;;  %2096 = vmatpush1.bf16.msra.mxu1 %v2269_v14  ;;  %v2365_v13 = vld [vmem:[%s2957_s26 + $0x1b4] ss:$8 sps:$4 sm:$0xff]   ;;  %v2367_v14 = vld [vmem:[%s2957_s26 + $0xb0] ss:$8 sps:$4 sm:$0xff]   ;;  %s246_s4 = scalar_lea.vmem [#allocation7], %s1837_s7  ;;  %s276_s27 = sand.u32 1, %s2585_s13  }
  0xaf   : > { %886 = vmatprep.subr.bf16.mxu0 %v2270_v16  ;;  %2081 = vmatprep.subr.bf16.mxu1 %v2270_v16  ;;  %v2368_v15 = vld [vmem:[%s2957_s26 + $0x1b0] ss:$8 sps:$4 sm:$0xff]   ;;  %v2369_v16 = vld [vmem:[%s2957_s26 + $0xc4] ss:$8 sps:$4 sm:$0xff]   ;;  %s1838_s10 = sshll.u32 %s276_s27, 9  ;;  %s3418_s24 = sld [smem:[#allocation16_spill]] }
  0xb0   : > { %s3086_s6 = scalar_lea.vmem [#allocation8], %s1838_s10  ;;  %s3419_s1 = sld [smem:[#allocation15_spill]] }
  0xb1   : > { %s1690_s21 = sshll.u32 %s3086_s6, 4  ;;  %s3420_s23 = sld [smem:[#allocation25_spill]]  ;;  %s3276_s21 = int_to_ptr.vmem [resolvable:$true] %s1690_s21 }
  0xb2   : > { %887 = vmatpush1.bf16.msra.mxu0 %v2272_v17  ;;  %2097 = vmatpush1.bf16.msra.mxu1 %v2272_v17  ;;  %v2371_v17 = vld [vmem:[%s2957_s26 + $0x1c4] ss:$8 sps:$4 sm:$0xff]   ;;  %s3284_s30 = scalar_lea.sflag [#allocation4], %s276_s27  ;;  %s2483_s11 = scalar_lea.vmem %s3276_s21, 8192 }
  0xb3   : > { %888 = vmatprep.subr.bf16.mxu0 %v2273_v18  ;;  %2082 = vmatprep.subr.bf16.mxu1 %v2273_v18  ;;  %v2373_v18 = vld [vmem:[%s2957_s26 + $0xc0] ss:$8 sps:$4 sm:$0xff]   ;;  %p2484_p7 = scmp.ne.s32.totalorder %s3276_s21, %s2483_s11  ;;  %p3422_p11 = scmp.ne.s32.totalorder %s3406_s28, 0 }
  0xb4   : > { %s2641_s29 = smov [#allocation8]  }
  0xb5   : > { %s2106_s17 = smul.u32 384, %s3418_s24  ;;  %p2485_p5 = pnand %p2484_p7, %p3422_p11 }
  0xb6   : > { %889 = vmatpush1.bf16.msra.mxu0 %v2275_v19  ;;  %2098 = vmatpush1.bf16.msra.mxu1 %v2275_v19  ;;  %v2374_v19 = vld [vmem:[%s2957_s26 + $0x1c0] ss:$8 sps:$4 sm:$0xff]   ;;  %s2001_s22 = sshll.u32 %s3419_s1, 1  ;;  %s2487_s18 = sshll.u32 %s2641_s29, 4  ;;  %s2488_s18 = int_to_ptr.vmem [resolvable:$false] %s2487_s18 }
  0xb7   : > { %890 = vmatprep.subr.bf16.mxu0 %v2276_v20  ;;  %2083 = vmatprep.subr.bf16.mxu1 %v2276_v20  ;;  %v2375_v20 = vld [vmem:[%s2957_s26 + $0xd4] ss:$8 sps:$4 sm:$0xff]   ;;  %s1687_s3 = sadd.s32 %s2106_s17, %s2001_s22  ;;  %p2486_p2 = pneg %p2485_p5 }
  0xb8   : > { %s2003_s20 = sshll.u32 %s1687_s3, 6  ;;  %s2489_s9 = scalar_lea.vmem %s2488_s18, 16384 }
  0xb9   : > { %s3274_s15 = scalar_lea.hbm %s3420_s23, %s2003_s20  ;;  %p2490_p3 = scmp.lt.s32.totalorder %s3276_s21, %s2488_s18 }
  0xba   : > { %891 = vmatpush1.bf16.msra.mxu0 %v2278_v21  ;;  %2099 = vmatpush1.bf16.msra.mxu1 %v2278_v21  ;;  %v2377_v21 = vld [vmem:[%s2957_s26 + $0x1d4] ss:$8 sps:$4 sm:$0xff]   ;;  %p2491_p9 = scmp.lt.s32.totalorder %s2489_s9, %s2483_s11 }
  0xbb   : > { %892 = vmatprep.subr.bf16.mxu0 %v2279_v22  ;;  %2084 = vmatprep.subr.bf16.mxu1 %v2279_v22  ;;  %v2379_v22 = vld [vmem:[%s2957_s26 + $0xd0] ss:$8 sps:$4 sm:$0xff]  }
  0xbc   : > { %p2492_p4 = por %p2491_p9, %p2490_p3 }
  0xbe   : > { %893 = vmatpush1.bf16.msra.mxu0 %v2281_v23  ;;  %2100 = vmatpush1.bf16.msra.mxu1 %v2281_v23  ;;  %v2380_v23 = vld [vmem:[%s2957_s26 + $0x1d0] ss:$8 sps:$4 sm:$0xff]   ;;  %p2493_p1 = pnand %p2492_p4, %p2486_p2 }
  0xbf   : > { %894 = vmatprep.subr.bf16.mxu0 %v2282_v24  ;;  %2085 = vmatprep.subr.bf16.mxu1 %v2282_v24  ;;  %v2381_v24 = vld [vmem:[%s2957_s26 + $0xe4] ss:$8 sps:$4 sm:$0xff]  }
  0xc2   : > { %895 = vmatpush1.bf16.msra.mxu0 %v2284_v25  ;;  %2101 = vmatpush1.bf16.msra.mxu1 %v2284_v25  ;;  %v2383_v25 = vld [vmem:[%s2957_s26 + $0x1e4] ss:$8 sps:$4 sm:$0xff]  }
  0xc3   : > { %896 = vmatprep.subr.bf16.mxu0 %v2285_v26  ;;  %2086 = vmatprep.subr.bf16.mxu1 %v2285_v26  ;;  %v2385_v26 = vld [vmem:[%s2957_s26 + $0xe0] ss:$8 sps:$4 sm:$0xff]  }
  0xc6   : > { %897 = vmatpush1.bf16.msra.mxu0 %v2287_v27  ;;  %2102 = vmatpush1.bf16.msra.mxu1 %v2287_v27  ;;  %v2386_v27 = vld [vmem:[%s2957_s26 + $0x1e0] ss:$8 sps:$4 sm:$0xff]  }
  0xc7   : > { %898 = vmatprep.subr.bf16.mxu0 %v2288_v28  ;;  %2087 = vmatprep.subr.bf16.mxu1 %v2288_v28  ;;  %v2387_v28 = vld [vmem:[%s2957_s26 + $0xf4] ss:$8 sps:$4 sm:$0xff]  }
  0xca   : > { %899 = vmatpush1.bf16.msra.mxu0 %v2290_v29  ;;  %2103 = vmatpush1.bf16.msra.mxu1 %v2290_v29  ;;  %v2389_v29 = vld [vmem:[%s2957_s26 + $0x1f4] ss:$8 sps:$4 sm:$0xff]  }
  0xcb   : > { %900 = vmatprep.subr.bf16.mxu0 %v2291_v30  ;;  %2088 = vmatprep.subr.bf16.mxu1 %v2291_v30  ;;  %v2391_v30 = vld [vmem:[%s2957_s26 + $0xf0] ss:$8 sps:$4 sm:$0xff]  }
  0xce   : > { %901 = vmatpush1.bf16.msra.mxu0 %v2293_v31  ;;  %2104 = vmatpush1.bf16.msra.mxu1 %v2293_v31  ;;  %v2392_v31 = vld [vmem:[%s2957_s26 + $0x1f0] ss:$8 sps:$4 sm:$0xff]   ;;  %s3421_s26 = smov %s3420_s23 }
  0xcf   : > { %902 = vmatprep.subr.bf16.mxu0 %v2294_v32  ;;  %2089 = vmatprep.subr.bf16.mxu1 %v2294_v32  ;;  %v382_v32 = vlaneseq }
  0xd2   : > { %903 = vmatpush1.bf16.msra.mxu0 %v2296_v33  ;;  %2105 = vmatpush1.bf16.msra.mxu1 %v2296_v33  ;;  %v383_v33 = vshrl.u32 %v382_v32, 7 }
  0xd5   : > { %905 = vmatmul.mubr.bf16.vlgmr.msra.gmra.mrb[0].mxu0 %v2297_v34  ;;  %1065 = vmatmul.mubr.bf16.vlgmr.msra.gmra.mrb[0].mxu1 %v2300_v35  ;;  %v384_v34 = vsub.s32 0, %v383_v33  ;;  %v380_v35 = vld [vmem:[%s246_s4] sm:$0x3] }
  0xd6   : > { %914 = vmatprep.mubr.bf16.mxu0 %v2303_v36  ;;  %1074 = vmatprep.mubr.bf16.mxu1 %v2305_v37  ;;  %v388_v36 = vsub.s32 1, %v383_v33 }
  0xd7   : > { %v3071_v37 = vrot.slane %v380_v35, %v384_v34 }
  0xdd   : > { %915 = vmatmul.mubr.bf16.gmra.mrb[4].mxu0 %v2307_v38  ;;  %1075 = vmatmul.mubr.bf16.gmra.mrb[4].mxu1 %v2308_v39  ;;  %v3074_v38 = vrot.slane %v380_v35, %v388_v36 }
  0xde   : > { %924 = vmatprep.mubr.bf16.mxu0 %v2309_v40  ;;  %1084 = vmatprep.mubr.bf16.mxu1 %v2311_v41 }
  0xe5   : > { %925 = vmatmul.mubr.bf16.gmra.mrb[8].mxu0 %v2313_v42  ;;  %1085 = vmatmul.mubr.bf16.gmra.mrb[8].mxu1 %v2314_v43 }
  0xe6   : > { %934 = vmatprep.mubr.bf16.mxu0 %v2315_v44  ;;  %1094 = vmatprep.mubr.bf16.mxu1 %v2317_v45 }
  0xed   : > { %935 = vmatmul.mubr.bf16.gmra.mrb[12].mxu0 %v2319_v46  ;;  %1095 = vmatmul.mubr.bf16.gmra.mrb[12].mxu1 %v2320_v47 }
  0xee   : > { %944 = vmatprep.mubr.bf16.mxu0 %v2321_v48  ;;  %1104 = vmatprep.mubr.bf16.mxu1 %v2323_v49 }
  0xf5   : > { %945 = vmatmul.mubr.bf16.gmra.mrb[16].mxu0 %v2325_v50  ;;  %1105 = vmatmul.mubr.bf16.gmra.mrb[16].mxu1 %v2326_v51 }
  0xf6   : > { %954 = vmatprep.mubr.bf16.mxu0 %v2327_v52  ;;  %1114 = vmatprep.mubr.bf16.mxu1 %v2329_v53 }
  0xfd   : > { %955 = vmatmul.mubr.bf16.gmra.mrb[20].mxu0 %v2331_v54  ;;  %1115 = vmatmul.mubr.bf16.gmra.mrb[20].mxu1 %v2332_v55 }
  0xfe   : > { %964 = vmatprep.mubr.bf16.mxu0 %v2333_v56  ;;  %1124 = vmatprep.mubr.bf16.mxu1 %v2335_v57 }
 0x105   : > { %965 = vmatmul.mubr.bf16.gmra.mrb[24].mxu0 %v2337_v58  ;;  %1125 = vmatmul.mubr.bf16.gmra.mrb[24].mxu1 %v2338_v59 }
 0x106   : > { %974 = vmatprep.mubr.bf16.mxu0 %v2339_v60  ;;  %1134 = vmatprep.mubr.bf16.mxu1 %v2341_v61 }
 0x10d   : > { %975 = vmatmul.mubr.bf16.gmra.mrb[28].mxu0 %v2343_v62  ;;  %1135 = vmatmul.mubr.bf16.gmra.mrb[28].mxu1 %v2344_v63 }
 0x10e   : > { %984 = vmatprep.mubr.bf16.mxu0 %v2345_v0  ;;  %1144 = vmatprep.mubr.bf16.mxu1 %v2347_v1 }
 0x115   : > { %985 = vmatmul.mubr.bf16.gmra.mrb[32].mxu0 %v2349_v2  ;;  %1145 = vmatmul.mubr.bf16.gmra.mrb[32].mxu1 %v2350_v3 }
 0x116   : > { %994 = vmatprep.mubr.bf16.mxu0 %v2351_v4  ;;  %1154 = vmatprep.mubr.bf16.mxu1 %v2353_v5 }
 0x11d   : > { %995 = vmatmul.mubr.bf16.gmra.mrb[36].mxu0 %v2355_v6  ;;  %1155 = vmatmul.mubr.bf16.gmra.mrb[36].mxu1 %v2356_v7 }
 0x11e   : > { %1004 = vmatprep.mubr.bf16.mxu0 %v2357_v8  ;;  %1164 = vmatprep.mubr.bf16.mxu1 %v2359_v9 }
 0x125   : > { %1005 = vmatmul.mubr.bf16.gmra.mrb[40].mxu0 %v2361_v10  ;;  %1165 = vmatmul.mubr.bf16.gmra.mrb[40].mxu1 %v2362_v11 }
 0x126   : > { %1014 = vmatprep.mubr.bf16.mxu0 %v2363_v12  ;;  %1174 = vmatprep.mubr.bf16.mxu1 %v2365_v13 }
 0x12d   : > { %1015 = vmatmul.mubr.bf16.gmra.mrb[44].mxu0 %v2367_v14  ;;  %1175 = vmatmul.mubr.bf16.gmra.mrb[44].mxu1 %v2368_v15 }
 0x12e   : > { %1024 = vmatprep.mubr.bf16.mxu0 %v2369_v16  ;;  %1184 = vmatprep.mubr.bf16.mxu1 %v2371_v17 }
 0x135   : > { %1025 = vmatmul.mubr.bf16.gmra.mrb[48].mxu0 %v2373_v18  ;;  %1185 = vmatmul.mubr.bf16.gmra.mrb[48].mxu1 %v2374_v19 }
 0x136   : > { %1034 = vmatprep.mubr.bf16.mxu0 %v2375_v20  ;;  %1194 = vmatprep.mubr.bf16.mxu1 %v2377_v21 }
 0x13d   : > { %1035 = vmatmul.mubr.bf16.gmra.mrb[52].mxu0 %v2379_v22  ;;  %1195 = vmatmul.mubr.bf16.gmra.mrb[52].mxu1 %v2380_v23 }
 0x13e   : > { %1044 = vmatprep.mubr.bf16.mxu0 %v2381_v24  ;;  %1204 = vmatprep.mubr.bf16.mxu1 %v2383_v25 }
 0x145   : > { %1045 = vmatmul.mubr.bf16.gmra.mrb[56].mxu0 %v2385_v26  ;;  %1205 = vmatmul.mubr.bf16.gmra.mrb[56].mxu1 %v2386_v27 }
 0x146   : > { %1054 = vmatprep.mubr.bf16.mxu0 %v2387_v28  ;;  %1214 = vmatprep.mubr.bf16.mxu1 %v2389_v29 }
 0x14d   : > { %1055 = vmatmul.mubr.bf16.gmra.mrb[60].mxu0 %v2391_v30  ;;  %1215 = vmatmul.mubr.bf16.gmra.mrb[60].mxu1 %v2392_v31 }
 0x1a8   : > { %v906_v39 = vpop.f32.mrb[0].mxu0  ;;  %v1066_v40 = vpop.f32.mrb[0].mxu1 }
 0x1a9   : > { %v907_v41 = vadd.f32 %v906_v39, %v3071_v37  ;;  %v1067_v42 = vadd.f32 %v1066_v40, %v3071_v37  ;;  %v908_v43 = vpop.f32.mrb[1].mxu0  ;;  %v1068_v44 = vpop.f32.mrb[1].mxu1 }
 0x1aa   : > { %v909_v45 = vadd.f32 %v908_v43, %v3074_v38  ;;  %v1069_v46 = vadd.f32 %v1068_v44, %v3074_v38  ;;  %v910_v47 = vpop.f32.mrb[2].mxu0  ;;  %v1070_v48 = vpop.f32.mrb[2].mxu1 }
 0x1ab   : > { %v911_v49 = vadd.f32 %v910_v47, %v3071_v37  ;;  %v1071_v50 = vadd.f32 %v1070_v48, %v3071_v37  ;;  %v912_v51 = vpop.f32.mrb[3].mxu0  ;;  %v1072_v52 = vpop.f32.mrb[3].mxu1 }
 0x1ac   : > { %v2010_v53 = vpack.c.bf16 %v909_v45, %v907_v41  ;;  %v2042_v54 = vpack.c.bf16 %v1069_v46, %v1067_v42  ;;  %v913_v55 = vadd.f32 %v912_v51, %v3074_v38  ;;  %v1073_v56 = vadd.f32 %v1072_v52, %v3074_v38 }
 0x1ae   : > { %1609 = vst [vmem:[%s3086_s6] sm:$0xff] %v2010_v53  ;;  %1641 = vst [vmem:[%s3086_s6 + $0x100] sm:$0xff] %v2042_v54  ;;  %v2011_v57 = vpack.c.bf16 %v913_v55, %v911_v49  ;;  %v2043_v58 = vpack.c.bf16 %v1073_v56, %v1071_v50 }
 0x1b0   : > { %1610 = vst [vmem:[%s3086_s6 + $0x8] sm:$0xff] %v2011_v57  ;;  %1642 = vst [vmem:[%s3086_s6 + $0x108] sm:$0xff] %v2043_v58  ;;  %v916_v59 = vpop.f32.mrb[4].mxu0  ;;  %v1076_v60 = vpop.f32.mrb[4].mxu1 }
 0x1b1   : > { %v917_v61 = vadd.f32 %v916_v59, %v3071_v37  ;;  %v1077_v62 = vadd.f32 %v1076_v60, %v3071_v37  ;;  %v918_v63 = vpop.f32.mrb[5].mxu0  ;;  %v1078_v0 = vpop.f32.mrb[5].mxu1 }
 0x1b2   : > { %v919_v1 = vadd.f32 %v918_v63, %v3074_v38  ;;  %v1079_v2 = vadd.f32 %v1078_v0, %v3074_v38  ;;  %v920_v3 = vpop.f32.mrb[6].mxu0  ;;  %v1080_v4 = vpop.f32.mrb[6].mxu1 }
 0x1b3   : > { %v921_v5 = vadd.f32 %v920_v3, %v3071_v37  ;;  %v1081_v6 = vadd.f32 %v1080_v4, %v3071_v37  ;;  %v922_v7 = vpop.f32.mrb[7].mxu0  ;;  %v1082_v8 = vpop.f32.mrb[7].mxu1 }
 0x1b4   : > { %v2012_v9 = vpack.c.bf16 %v919_v1, %v917_v61  ;;  %v2044_v10 = vpack.c.bf16 %v1079_v2, %v1077_v62  ;;  %v923_v11 = vadd.f32 %v922_v7, %v3074_v38  ;;  %v1083_v12 = vadd.f32 %v1082_v8, %v3074_v38 }
 0x1b6   : > { %1611 = vst [vmem:[%s3086_s6 + $0x10] sm:$0xff] %v2012_v9  ;;  %1643 = vst [vmem:[%s3086_s6 + $0x110] sm:$0xff] %v2044_v10  ;;  %v2013_v13 = vpack.c.bf16 %v923_v11, %v921_v5  ;;  %v2045_v14 = vpack.c.bf16 %v1083_v12, %v1081_v6 }
 0x1b8   : > { %1612 = vst [vmem:[%s3086_s6 + $0x18] sm:$0xff] %v2013_v13  ;;  %1644 = vst [vmem:[%s3086_s6 + $0x118] sm:$0xff] %v2045_v14  ;;  %v926_v15 = vpop.f32.mrb[8].mxu0  ;;  %v1086_v16 = vpop.f32.mrb[8].mxu1 }
 0x1b9   : > { %v927_v17 = vadd.f32 %v926_v15, %v3071_v37  ;;  %v1087_v18 = vadd.f32 %v1086_v16, %v3071_v37  ;;  %v928_v19 = vpop.f32.mrb[9].mxu0  ;;  %v1088_v20 = vpop.f32.mrb[9].mxu1 }
 0x1ba   : > { %v929_v21 = vadd.f32 %v928_v19, %v3074_v38  ;;  %v1089_v22 = vadd.f32 %v1088_v20, %v3074_v38  ;;  %v930_v23 = vpop.f32.mrb[10].mxu0  ;;  %v1090_v24 = vpop.f32.mrb[10].mxu1 }
 0x1bb   : > { %v931_v25 = vadd.f32 %v930_v23, %v3071_v37  ;;  %v1091_v26 = vadd.f32 %v1090_v24, %v3071_v37  ;;  %v932_v27 = vpop.f32.mrb[11].mxu0  ;;  %v1092_v28 = vpop.f32.mrb[11].mxu1 }
 0x1bc   : > { %v2014_v29 = vpack.c.bf16 %v929_v21, %v927_v17  ;;  %v2046_v30 = vpack.c.bf16 %v1089_v22, %v1087_v18  ;;  %v933_v31 = vadd.f32 %v932_v27, %v3074_v38  ;;  %v1093_v32 = vadd.f32 %v1092_v28, %v3074_v38 }
 0x1be   : > { %1613 = vst [vmem:[%s3086_s6 + $0x20] sm:$0xff] %v2014_v29  ;;  %1645 = vst [vmem:[%s3086_s6 + $0x120] sm:$0xff] %v2046_v30  ;;  %v2015_v33 = vpack.c.bf16 %v933_v31, %v931_v25  ;;  %v2047_v34 = vpack.c.bf16 %v1093_v32, %v1091_v26 }
 0x1c0   : > { %1614 = vst [vmem:[%s3086_s6 + $0x28] sm:$0xff] %v2015_v33  ;;  %1646 = vst [vmem:[%s3086_s6 + $0x128] sm:$0xff] %v2047_v34  ;;  %v936_v35 = vpop.f32.mrb[12].mxu0  ;;  %v1096_v36 = vpop.f32.mrb[12].mxu1 }
 0x1c1   : > { %v937_v39 = vadd.f32 %v936_v35, %v3071_v37  ;;  %v1097_v40 = vadd.f32 %v1096_v36, %v3071_v37  ;;  %v938_v41 = vpop.f32.mrb[13].mxu0  ;;  %v1098_v42 = vpop.f32.mrb[13].mxu1 }
 0x1c2   : > { %v939_v43 = vadd.f32 %v938_v41, %v3074_v38  ;;  %v1099_v44 = vadd.f32 %v1098_v42, %v3074_v38  ;;  %v940_v45 = vpop.f32.mrb[14].mxu0  ;;  %v1100_v46 = vpop.f32.mrb[14].mxu1 }
 0x1c3   : > { %v941_v47 = vadd.f32 %v940_v45, %v3071_v37  ;;  %v1101_v48 = vadd.f32 %v1100_v46, %v3071_v37  ;;  %v942_v49 = vpop.f32.mrb[15].mxu0  ;;  %v1102_v50 = vpop.f32.mrb[15].mxu1 }
 0x1c4   : > { %v2016_v51 = vpack.c.bf16 %v939_v43, %v937_v39  ;;  %v2048_v52 = vpack.c.bf16 %v1099_v44, %v1097_v40  ;;  %v943_v53 = vadd.f32 %v942_v49, %v3074_v38  ;;  %v1103_v54 = vadd.f32 %v1102_v50, %v3074_v38 }
 0x1c6   : > { %1615 = vst [vmem:[%s3086_s6 + $0x30] sm:$0xff] %v2016_v51  ;;  %1647 = vst [vmem:[%s3086_s6 + $0x130] sm:$0xff] %v2048_v52  ;;  %v2017_v55 = vpack.c.bf16 %v943_v53, %v941_v47  ;;  %v2049_v56 = vpack.c.bf16 %v1103_v54, %v1101_v48 }
 0x1c8   : > { %1616 = vst [vmem:[%s3086_s6 + $0x38] sm:$0xff] %v2017_v55  ;;  %1648 = vst [vmem:[%s3086_s6 + $0x138] sm:$0xff] %v2049_v56  ;;  %v946_v57 = vpop.f32.mrb[16].mxu0  ;;  %v1106_v58 = vpop.f32.mrb[16].mxu1 }
 0x1c9   : > { %v947_v59 = vadd.f32 %v946_v57, %v3071_v37  ;;  %v1107_v60 = vadd.f32 %v1106_v58, %v3071_v37  ;;  %v948_v61 = vpop.f32.mrb[17].mxu0  ;;  %v1108_v62 = vpop.f32.mrb[17].mxu1 }
 0x1ca   : > { %v949_v63 = vadd.f32 %v948_v61, %v3074_v38  ;;  %v1109_v0 = vadd.f32 %v1108_v62, %v3074_v38  ;;  %v950_v1 = vpop.f32.mrb[18].mxu0  ;;  %v1110_v2 = vpop.f32.mrb[18].mxu1 }
 0x1cb   : > { %v951_v3 = vadd.f32 %v950_v1, %v3071_v37  ;;  %v1111_v4 = vadd.f32 %v1110_v2, %v3071_v37  ;;  %v952_v5 = vpop.f32.mrb[19].mxu0  ;;  %v1112_v6 = vpop.f32.mrb[19].mxu1 }
 0x1cc   : > { %v2018_v7 = vpack.c.bf16 %v949_v63, %v947_v59  ;;  %v2050_v8 = vpack.c.bf16 %v1109_v0, %v1107_v60  ;;  %v953_v9 = vadd.f32 %v952_v5, %v3074_v38  ;;  %v1113_v10 = vadd.f32 %v1112_v6, %v3074_v38 }
 0x1ce   : > { %1617 = vst [vmem:[%s3086_s6 + $0x40] sm:$0xff] %v2018_v7  ;;  %1649 = vst [vmem:[%s3086_s6 + $0x140] sm:$0xff] %v2050_v8  ;;  %v2019_v11 = vpack.c.bf16 %v953_v9, %v951_v3  ;;  %v2051_v12 = vpack.c.bf16 %v1113_v10, %v1111_v4 }
 0x1d0   : > { %1618 = vst [vmem:[%s3086_s6 + $0x48] sm:$0xff] %v2019_v11  ;;  %1650 = vst [vmem:[%s3086_s6 + $0x148] sm:$0xff] %v2051_v12  ;;  %v956_v13 = vpop.f32.mrb[20].mxu0  ;;  %v1116_v14 = vpop.f32.mrb[20].mxu1 }
 0x1d1   : > { %v957_v15 = vadd.f32 %v956_v13, %v3071_v37  ;;  %v1117_v16 = vadd.f32 %v1116_v14, %v3071_v37  ;;  %v958_v17 = vpop.f32.mrb[21].mxu0  ;;  %v1118_v18 = vpop.f32.mrb[21].mxu1 }
 0x1d2   : > { %v959_v19 = vadd.f32 %v958_v17, %v3074_v38  ;;  %v1119_v20 = vadd.f32 %v1118_v18, %v3074_v38  ;;  %v960_v21 = vpop.f32.mrb[22].mxu0  ;;  %v1120_v22 = vpop.f32.mrb[22].mxu1 }
 0x1d3   : > { %v961_v23 = vadd.f32 %v960_v21, %v3071_v37  ;;  %v1121_v24 = vadd.f32 %v1120_v22, %v3071_v37  ;;  %v962_v25 = vpop.f32.mrb[23].mxu0  ;;  %v1122_v26 = vpop.f32.mrb[23].mxu1 }
 0x1d4   : > { %v2020_v27 = vpack.c.bf16 %v959_v19, %v957_v15  ;;  %v2052_v28 = vpack.c.bf16 %v1119_v20, %v1117_v16  ;;  %v963_v29 = vadd.f32 %v962_v25, %v3074_v38  ;;  %v1123_v30 = vadd.f32 %v1122_v26, %v3074_v38 }
 0x1d6   : > { %1619 = vst [vmem:[%s3086_s6 + $0x50] sm:$0xff] %v2020_v27  ;;  %1651 = vst [vmem:[%s3086_s6 + $0x150] sm:$0xff] %v2052_v28  ;;  %v2021_v31 = vpack.c.bf16 %v963_v29, %v961_v23  ;;  %v2053_v32 = vpack.c.bf16 %v1123_v30, %v1121_v24 }
 0x1d8   : > { %1620 = vst [vmem:[%s3086_s6 + $0x58] sm:$0xff] %v2021_v31  ;;  %1652 = vst [vmem:[%s3086_s6 + $0x158] sm:$0xff] %v2053_v32  ;;  %v966_v33 = vpop.f32.mrb[24].mxu0  ;;  %v1126_v34 = vpop.f32.mrb[24].mxu1 }
 0x1d9   : > { %v967_v35 = vadd.f32 %v966_v33, %v3071_v37  ;;  %v1127_v36 = vadd.f32 %v1126_v34, %v3071_v37  ;;  %v968_v39 = vpop.f32.mrb[25].mxu0  ;;  %v1128_v40 = vpop.f32.mrb[25].mxu1 }
 0x1da   : > { %v969_v41 = vadd.f32 %v968_v39, %v3074_v38  ;;  %v1129_v42 = vadd.f32 %v1128_v40, %v3074_v38  ;;  %v970_v43 = vpop.f32.mrb[26].mxu0  ;;  %v1130_v44 = vpop.f32.mrb[26].mxu1 }
 0x1db   : > { %v971_v45 = vadd.f32 %v970_v43, %v3071_v37  ;;  %v1131_v46 = vadd.f32 %v1130_v44, %v3071_v37  ;;  %v972_v47 = vpop.f32.mrb[27].mxu0  ;;  %v1132_v48 = vpop.f32.mrb[27].mxu1 }
 0x1dc   : > { %v2022_v49 = vpack.c.bf16 %v969_v41, %v967_v35  ;;  %v2054_v50 = vpack.c.bf16 %v1129_v42, %v1127_v36  ;;  %v973_v51 = vadd.f32 %v972_v47, %v3074_v38  ;;  %v1133_v52 = vadd.f32 %v1132_v48, %v3074_v38 }
 0x1de   : > { %1621 = vst [vmem:[%s3086_s6 + $0x60] sm:$0xff] %v2022_v49  ;;  %1653 = vst [vmem:[%s3086_s6 + $0x160] sm:$0xff] %v2054_v50  ;;  %v2023_v53 = vpack.c.bf16 %v973_v51, %v971_v45  ;;  %v2055_v54 = vpack.c.bf16 %v1133_v52, %v1131_v46 }
 0x1e0   : > { %1622 = vst [vmem:[%s3086_s6 + $0x68] sm:$0xff] %v2023_v53  ;;  %1654 = vst [vmem:[%s3086_s6 + $0x168] sm:$0xff] %v2055_v54  ;;  %v976_v55 = vpop.f32.mrb[28].mxu0  ;;  %v1136_v56 = vpop.f32.mrb[28].mxu1 }
 0x1e1   : > { %v977_v57 = vadd.f32 %v976_v55, %v3071_v37  ;;  %v1137_v58 = vadd.f32 %v1136_v56, %v3071_v37  ;;  %v978_v59 = vpop.f32.mrb[29].mxu0  ;;  %v1138_v60 = vpop.f32.mrb[29].mxu1 }
 0x1e2   : > { %v979_v61 = vadd.f32 %v978_v59, %v3074_v38  ;;  %v1139_v62 = vadd.f32 %v1138_v60, %v3074_v38  ;;  %v980_v63 = vpop.f32.mrb[30].mxu0  ;;  %v1140_v0 = vpop.f32.mrb[30].mxu1 }
 0x1e3   : > { %v981_v1 = vadd.f32 %v980_v63, %v3071_v37  ;;  %v1141_v2 = vadd.f32 %v1140_v0, %v3071_v37  ;;  %v982_v3 = vpop.f32.mrb[31].mxu0  ;;  %v1142_v4 = vpop.f32.mrb[31].mxu1 }
 0x1e4   : > { %v2024_v5 = vpack.c.bf16 %v979_v61, %v977_v57  ;;  %v2056_v6 = vpack.c.bf16 %v1139_v62, %v1137_v58  ;;  %v983_v7 = vadd.f32 %v982_v3, %v3074_v38  ;;  %v1143_v8 = vadd.f32 %v1142_v4, %v3074_v38 }
 0x1e6   : > { %1623 = vst [vmem:[%s3086_s6 + $0x70] sm:$0xff] %v2024_v5  ;;  %1655 = vst [vmem:[%s3086_s6 + $0x170] sm:$0xff] %v2056_v6  ;;  %v2025_v9 = vpack.c.bf16 %v983_v7, %v981_v1  ;;  %v2057_v10 = vpack.c.bf16 %v1143_v8, %v1141_v2 }
 0x1e8   : > { %1624 = vst [vmem:[%s3086_s6 + $0x78] sm:$0xff] %v2025_v9  ;;  %1656 = vst [vmem:[%s3086_s6 + $0x178] sm:$0xff] %v2057_v10  ;;  %v986_v11 = vpop.f32.mrb[32].mxu0  ;;  %v1146_v12 = vpop.f32.mrb[32].mxu1 }
 0x1e9   : > { %v987_v13 = vadd.f32 %v986_v11, %v3071_v37  ;;  %v1147_v14 = vadd.f32 %v1146_v12, %v3071_v37  ;;  %v988_v15 = vpop.f32.mrb[33].mxu0  ;;  %v1148_v16 = vpop.f32.mrb[33].mxu1 }
 0x1ea   : > { %v989_v17 = vadd.f32 %v988_v15, %v3074_v38  ;;  %v1149_v18 = vadd.f32 %v1148_v16, %v3074_v38  ;;  %v990_v19 = vpop.f32.mrb[34].mxu0  ;;  %v1150_v20 = vpop.f32.mrb[34].mxu1 }
 0x1eb   : > { %v991_v21 = vadd.f32 %v990_v19, %v3071_v37  ;;  %v1151_v22 = vadd.f32 %v1150_v20, %v3071_v37  ;;  %v992_v23 = vpop.f32.mrb[35].mxu0  ;;  %v1152_v24 = vpop.f32.mrb[35].mxu1 }
 0x1ec   : > { %v2026_v25 = vpack.c.bf16 %v989_v17, %v987_v13  ;;  %v2058_v26 = vpack.c.bf16 %v1149_v18, %v1147_v14  ;;  %v993_v27 = vadd.f32 %v992_v23, %v3074_v38  ;;  %v1153_v28 = vadd.f32 %v1152_v24, %v3074_v38 }
 0x1ee   : > { %1625 = vst [vmem:[%s3086_s6 + $0x80] sm:$0xff] %v2026_v25  ;;  %1657 = vst [vmem:[%s3086_s6 + $0x180] sm:$0xff] %v2058_v26  ;;  %v2027_v29 = vpack.c.bf16 %v993_v27, %v991_v21  ;;  %v2059_v30 = vpack.c.bf16 %v1153_v28, %v1151_v22 }
 0x1f0   : > { %1626 = vst [vmem:[%s3086_s6 + $0x88] sm:$0xff] %v2027_v29  ;;  %1658 = vst [vmem:[%s3086_s6 + $0x188] sm:$0xff] %v2059_v30  ;;  %v996_v31 = vpop.f32.mrb[36].mxu0  ;;  %v1156_v32 = vpop.f32.mrb[36].mxu1 }
 0x1f1   : > { %v997_v33 = vadd.f32 %v996_v31, %v3071_v37  ;;  %v1157_v34 = vadd.f32 %v1156_v32, %v3071_v37  ;;  %v998_v35 = vpop.f32.mrb[37].mxu0  ;;  %v1158_v36 = vpop.f32.mrb[37].mxu1 }
 0x1f2   : > { %v999_v39 = vadd.f32 %v998_v35, %v3074_v38  ;;  %v1159_v40 = vadd.f32 %v1158_v36, %v3074_v38  ;;  %v1000_v41 = vpop.f32.mrb[38].mxu0  ;;  %v1160_v42 = vpop.f32.mrb[38].mxu1 }
 0x1f3   : > { %v1001_v43 = vadd.f32 %v1000_v41, %v3071_v37  ;;  %v1161_v44 = vadd.f32 %v1160_v42, %v3071_v37  ;;  %v1002_v45 = vpop.f32.mrb[39].mxu0  ;;  %v1162_v46 = vpop.f32.mrb[39].mxu1 }
 0x1f4   : > { %v2028_v47 = vpack.c.bf16 %v999_v39, %v997_v33  ;;  %v2060_v48 = vpack.c.bf16 %v1159_v40, %v1157_v34  ;;  %v1003_v49 = vadd.f32 %v1002_v45, %v3074_v38  ;;  %v1163_v50 = vadd.f32 %v1162_v46, %v3074_v38 }
 0x1f6   : > { %1627 = vst [vmem:[%s3086_s6 + $0x90] sm:$0xff] %v2028_v47  ;;  %1659 = vst [vmem:[%s3086_s6 + $0x190] sm:$0xff] %v2060_v48  ;;  %v2029_v51 = vpack.c.bf16 %v1003_v49, %v1001_v43  ;;  %v2061_v52 = vpack.c.bf16 %v1163_v50, %v1161_v44 }
 0x1f8   : > { %1628 = vst [vmem:[%s3086_s6 + $0x98] sm:$0xff] %v2029_v51  ;;  %1660 = vst [vmem:[%s3086_s6 + $0x198] sm:$0xff] %v2061_v52  ;;  %v1006_v53 = vpop.f32.mrb[40].mxu0  ;;  %v1166_v54 = vpop.f32.mrb[40].mxu1 }
 0x1f9   : > { %v1007_v55 = vadd.f32 %v1006_v53, %v3071_v37  ;;  %v1167_v56 = vadd.f32 %v1166_v54, %v3071_v37  ;;  %v1008_v57 = vpop.f32.mrb[41].mxu0  ;;  %v1168_v58 = vpop.f32.mrb[41].mxu1 }
 0x1fa   : > { %v1009_v59 = vadd.f32 %v1008_v57, %v3074_v38  ;;  %v1169_v60 = vadd.f32 %v1168_v58, %v3074_v38  ;;  %v1010_v61 = vpop.f32.mrb[42].mxu0  ;;  %v1170_v62 = vpop.f32.mrb[42].mxu1 }
 0x1fb   : > { %v1011_v63 = vadd.f32 %v1010_v61, %v3071_v37  ;;  %v1171_v0 = vadd.f32 %v1170_v62, %v3071_v37  ;;  %v1012_v1 = vpop.f32.mrb[43].mxu0  ;;  %v1172_v2 = vpop.f32.mrb[43].mxu1 }
 0x1fc   : > { %v2030_v3 = vpack.c.bf16 %v1009_v59, %v1007_v55  ;;  %v2062_v4 = vpack.c.bf16 %v1169_v60, %v1167_v56  ;;  %v1013_v5 = vadd.f32 %v1012_v1, %v3074_v38  ;;  %v1173_v6 = vadd.f32 %v1172_v2, %v3074_v38 }
 0x1fe   : > { %1629 = vst [vmem:[%s3086_s6 + $0xa0] sm:$0xff] %v2030_v3  ;;  %1661 = vst [vmem:[%s3086_s6 + $0x1a0] sm:$0xff] %v2062_v4  ;;  %v2031_v7 = vpack.c.bf16 %v1013_v5, %v1011_v63  ;;  %v2063_v8 = vpack.c.bf16 %v1173_v6, %v1171_v0 }
 0x200   : > { %1630 = vst [vmem:[%s3086_s6 + $0xa8] sm:$0xff] %v2031_v7  ;;  %1662 = vst [vmem:[%s3086_s6 + $0x1a8] sm:$0xff] %v2063_v8  ;;  %v1016_v9 = vpop.f32.mrb[44].mxu0  ;;  %v1176_v10 = vpop.f32.mrb[44].mxu1 }
 0x201   : > { %v1017_v11 = vadd.f32 %v1016_v9, %v3071_v37  ;;  %v1177_v12 = vadd.f32 %v1176_v10, %v3071_v37  ;;  %v1018_v13 = vpop.f32.mrb[45].mxu0  ;;  %v1178_v14 = vpop.f32.mrb[45].mxu1 }
 0x202   : > { %v1019_v15 = vadd.f32 %v1018_v13, %v3074_v38  ;;  %v1179_v16 = vadd.f32 %v1178_v14, %v3074_v38  ;;  %v1020_v17 = vpop.f32.mrb[46].mxu0  ;;  %v1180_v18 = vpop.f32.mrb[46].mxu1 }
 0x203   : > { %v1021_v19 = vadd.f32 %v1020_v17, %v3071_v37  ;;  %v1181_v20 = vadd.f32 %v1180_v18, %v3071_v37  ;;  %v1022_v21 = vpop.f32.mrb[47].mxu0  ;;  %v1182_v22 = vpop.f32.mrb[47].mxu1 }
 0x204   : > { %v2032_v23 = vpack.c.bf16 %v1019_v15, %v1017_v11  ;;  %v2064_v24 = vpack.c.bf16 %v1179_v16, %v1177_v12  ;;  %v1023_v25 = vadd.f32 %v1022_v21, %v3074_v38  ;;  %v1183_v26 = vadd.f32 %v1182_v22, %v3074_v38 }
 0x206   : > { %1631 = vst [vmem:[%s3086_s6 + $0xb0] sm:$0xff] %v2032_v23  ;;  %1663 = vst [vmem:[%s3086_s6 + $0x1b0] sm:$0xff] %v2064_v24  ;;  %v2033_v27 = vpack.c.bf16 %v1023_v25, %v1021_v19  ;;  %v2065_v28 = vpack.c.bf16 %v1183_v26, %v1181_v20 }
 0x208   : > { %1632 = vst [vmem:[%s3086_s6 + $0xb8] sm:$0xff] %v2033_v27  ;;  %1664 = vst [vmem:[%s3086_s6 + $0x1b8] sm:$0xff] %v2065_v28  ;;  %v1026_v29 = vpop.f32.mrb[48].mxu0  ;;  %v1186_v30 = vpop.f32.mrb[48].mxu1 }
 0x209   : > { %v1027_v31 = vadd.f32 %v1026_v29, %v3071_v37  ;;  %v1187_v32 = vadd.f32 %v1186_v30, %v3071_v37  ;;  %v1028_v33 = vpop.f32.mrb[49].mxu0  ;;  %v1188_v34 = vpop.f32.mrb[49].mxu1 }
 0x20a   : > { %v1029_v35 = vadd.f32 %v1028_v33, %v3074_v38  ;;  %v1189_v36 = vadd.f32 %v1188_v34, %v3074_v38  ;;  %v1030_v39 = vpop.f32.mrb[50].mxu0  ;;  %v1190_v40 = vpop.f32.mrb[50].mxu1 }
 0x20b   : > { %v1031_v41 = vadd.f32 %v1030_v39, %v3071_v37  ;;  %v1191_v42 = vadd.f32 %v1190_v40, %v3071_v37  ;;  %v1032_v43 = vpop.f32.mrb[51].mxu0  ;;  %v1192_v44 = vpop.f32.mrb[51].mxu1 }
 0x20c   : > { %v2034_v45 = vpack.c.bf16 %v1029_v35, %v1027_v31  ;;  %v2066_v46 = vpack.c.bf16 %v1189_v36, %v1187_v32  ;;  %v1033_v47 = vadd.f32 %v1032_v43, %v3074_v38  ;;  %v1193_v48 = vadd.f32 %v1192_v44, %v3074_v38 }
 0x20e   : > { %1633 = vst [vmem:[%s3086_s6 + $0xc0] sm:$0xff] %v2034_v45  ;;  %1665 = vst [vmem:[%s3086_s6 + $0x1c0] sm:$0xff] %v2066_v46  ;;  %v2035_v49 = vpack.c.bf16 %v1033_v47, %v1031_v41  ;;  %v2067_v50 = vpack.c.bf16 %v1193_v48, %v1191_v42 }
 0x210   : > { %1634 = vst [vmem:[%s3086_s6 + $0xc8] sm:$0xff] %v2035_v49  ;;  %1666 = vst [vmem:[%s3086_s6 + $0x1c8] sm:$0xff] %v2067_v50  ;;  %v1036_v51 = vpop.f32.mrb[52].mxu0  ;;  %v1196_v52 = vpop.f32.mrb[52].mxu1 }
 0x211   : > { %v1037_v53 = vadd.f32 %v1036_v51, %v3071_v37  ;;  %v1197_v54 = vadd.f32 %v1196_v52, %v3071_v37  ;;  %v1038_v55 = vpop.f32.mrb[53].mxu0  ;;  %v1198_v56 = vpop.f32.mrb[53].mxu1 }
 0x212   : > { %v1039_v57 = vadd.f32 %v1038_v55, %v3074_v38  ;;  %v1199_v58 = vadd.f32 %v1198_v56, %v3074_v38  ;;  %v1040_v59 = vpop.f32.mrb[54].mxu0  ;;  %v1200_v60 = vpop.f32.mrb[54].mxu1 }
 0x213   : > { %v1041_v61 = vadd.f32 %v1040_v59, %v3071_v37  ;;  %v1201_v62 = vadd.f32 %v1200_v60, %v3071_v37  ;;  %v1042_v63 = vpop.f32.mrb[55].mxu0  ;;  %v1202_v0 = vpop.f32.mrb[55].mxu1 }
 0x214   : > { %v2036_v1 = vpack.c.bf16 %v1039_v57, %v1037_v53  ;;  %v2068_v2 = vpack.c.bf16 %v1199_v58, %v1197_v54  ;;  %v1043_v3 = vadd.f32 %v1042_v63, %v3074_v38  ;;  %v1203_v4 = vadd.f32 %v1202_v0, %v3074_v38 }
 0x216   : > { %1635 = vst [vmem:[%s3086_s6 + $0xd0] sm:$0xff] %v2036_v1  ;;  %1667 = vst [vmem:[%s3086_s6 + $0x1d0] sm:$0xff] %v2068_v2  ;;  %v2037_v5 = vpack.c.bf16 %v1043_v3, %v1041_v61  ;;  %v2069_v6 = vpack.c.bf16 %v1203_v4, %v1201_v62 }
 0x218   : > { %1636 = vst [vmem:[%s3086_s6 + $0xd8] sm:$0xff] %v2037_v5  ;;  %1668 = vst [vmem:[%s3086_s6 + $0x1d8] sm:$0xff] %v2069_v6  ;;  %v1046_v7 = vpop.f32.mrb[56].mxu0  ;;  %v1206_v8 = vpop.f32.mrb[56].mxu1 }
 0x219   : > { %v1047_v9 = vadd.f32 %v1046_v7, %v3071_v37  ;;  %v1207_v10 = vadd.f32 %v1206_v8, %v3071_v37  ;;  %v1048_v11 = vpop.f32.mrb[57].mxu0  ;;  %v1208_v12 = vpop.f32.mrb[57].mxu1 }
 0x21a   : > { %v1049_v13 = vadd.f32 %v1048_v11, %v3074_v38  ;;  %v1209_v14 = vadd.f32 %v1208_v12, %v3074_v38  ;;  %v1050_v15 = vpop.f32.mrb[58].mxu0  ;;  %v1210_v16 = vpop.f32.mrb[58].mxu1 }
 0x21b   : > { %v1051_v17 = vadd.f32 %v1050_v15, %v3071_v37  ;;  %v1211_v18 = vadd.f32 %v1210_v16, %v3071_v37  ;;  %v1052_v19 = vpop.f32.mrb[59].mxu0  ;;  %v1212_v20 = vpop.f32.mrb[59].mxu1 }
 0x21c   : > { %v2038_v21 = vpack.c.bf16 %v1049_v13, %v1047_v9  ;;  %v2070_v22 = vpack.c.bf16 %v1209_v14, %v1207_v10  ;;  %v1053_v23 = vadd.f32 %v1052_v19, %v3074_v38  ;;  %v1213_v24 = vadd.f32 %v1212_v20, %v3074_v38 }
 0x21e   : > { %1637 = vst [vmem:[%s3086_s6 + $0xe0] sm:$0xff] %v2038_v21  ;;  %1669 = vst [vmem:[%s3086_s6 + $0x1e0] sm:$0xff] %v2070_v22  ;;  %v2039_v25 = vpack.c.bf16 %v1053_v23, %v1051_v17  ;;  %v2071_v26 = vpack.c.bf16 %v1213_v24, %v1211_v18 }
 0x220   : > { %1638 = vst [vmem:[%s3086_s6 + $0xe8] sm:$0xff] %v2039_v25  ;;  %1670 = vst [vmem:[%s3086_s6 + $0x1e8] sm:$0xff] %v2071_v26  ;;  %v1056_v27 = vpop.f32.mrb[60].mxu0  ;;  %v1216_v28 = vpop.f32.mrb[60].mxu1 }
 0x221   : > { %v1057_v29 = vadd.f32 %v1056_v27, %v3071_v37  ;;  %v1217_v30 = vadd.f32 %v1216_v28, %v3071_v37  ;;  %v1058_v31 = vpop.f32.mrb[61].mxu0  ;;  %v1218_v32 = vpop.f32.mrb[61].mxu1 }
 0x222   : > { %v1059_v33 = vadd.f32 %v1058_v31, %v3074_v38  ;;  %v1219_v34 = vadd.f32 %v1218_v32, %v3074_v38  ;;  %v1060_v35 = vpop.f32.mrb[62].mxu0  ;;  %v1220_v36 = vpop.f32.mrb[62].mxu1 }
 0x223   : > { %v1061_v39 = vadd.f32 %v1060_v35, %v3071_v37  ;;  %v1221_v40 = vadd.f32 %v1220_v36, %v3071_v37  ;;  %v1062_v41 = vpop.f32.mrb[63].mxu0  ;;  %v1222_v42 = vpop.f32.mrb[63].mxu1 }
 0x224   : > { %v2040_v43 = vpack.c.bf16 %v1059_v33, %v1057_v29  ;;  %v2072_v44 = vpack.c.bf16 %v1219_v34, %v1217_v30  ;;  %v1063_v45 = vadd.f32 %v1062_v41, %v3074_v38  ;;  %v1223_v46 = vadd.f32 %v1222_v42, %v3074_v38 }
 0x226   : > { %1639 = vst [vmem:[%s3086_s6 + $0xf0] sm:$0xff] %v2040_v43  ;;  %1671 = vst [vmem:[%s3086_s6 + $0x1f0] sm:$0xff] %v2072_v44  ;;  %v2041_v37 = vpack.c.bf16 %v1063_v45, %v1061_v39  ;;  %v2073_v47 = vpack.c.bf16 %v1223_v46, %v1221_v40 }
 0x228   : > { %1640 = vst [vmem:[%s3086_s6 + $0xf8] sm:$0xff] %v2041_v37  ;;  %1672 = vst [vmem:[%s3086_s6 + $0x1f8] sm:$0xff] %v2073_v47 }
 0x229   : > { %2496 = shalt.err (!%p2493_p1)
}
 0x22a   : > { %s2497_s7 = scalar_lea.hbm %s3274_s15, 8192  ;;  %s2501_s10 = scalar_lea.hbm %s3421_s26, 49152 }
 0x22b   : > { %p2498_p0 = scmp.ne.s32.totalorder %s3274_s15, %s2497_s7  ;;  %p2502_p8 = scmp.lt.u32.totalorder %s3274_s15, %s3421_s26 }
 0x22c   : > { %p2503_p10 = scmp.lt.u32.totalorder %s2501_s10, %s2497_s7  ;;  %p2505_p7 = scmp.lt.u32.totalorder %s2497_s7, %s3274_s15 }
 0x22d   : > { %p2499_p12 = pnand %p2498_p0, %p3422_p11 }
 0x22e   : > { %p2504_p6 = por %p2503_p10, %p2502_p8 }
 0x22f   : > { %p2500_p13 = pneg %p2499_p12 }
 0x230   : > { %p2506_p5 = por %p2505_p7, %p2504_p6 }
 0x232   : > { %p2507_p2 = pnand %p2506_p5, %p2500_p13 }
 0x234   : > { %2510 = shalt.err (!%p2507_p2)
}
 0x235   : > { %s2642_s1 = smov 128   ;;  %s2643_s17 = smov 384  }
 0x236   : > { %s2644_s22 = smov 8  }
 0x237   : > { %2113 = dma.vmem_to_hbm [thread:$0]  (%p3422_p11), %s3276_s21, 8192, %s3274_s15, %s3284_s30, %s2642_s1, %s2643_s17, %s2644_s22  }
 0x238 PF: > { %p2130_p3 = scmp.ge.s32.totalorder %s2633_s25, 2  ;;  %s1705_s3 = sand.u32 1, %s2581_s12  }
 0x239   : > { %p3423_p9 = scmp.ne.s32.totalorder %s3407_s8, 0  ;;  %s1706_s20 = scalar_lea.sflag [#allocation4], %s1705_s3 }
 0x23b   : > { %p2126_p4 = pnand %p2130_p3, %p3423_p9 }
 0x23d   : > { %2576 = dma.done.wait (!%p2126_p4), %s1706_s20, 8192  }
 0x23e   : > { %2578 = vsyncadd (!%p2126_p4), %s1706_s20, 4294959104  ;;  %s22_s25 = sadd.s32 1, %s2633_s25   ;;  %s3425_s28 = sld [smem:[#allocation12_spill]] }
 0x23f   : > { %p3313_p1 = scmp.ge.s32.totalorder %s22_s25, 8   ;;  %s3426_s14 = sld [smem:[#allocation23_spill]] }
 0x240   : > { %s3427_s21 = sld [smem:[#allocation13_spill]]  ;;  %s3428_s17 = sld [smem:[#allocation21_spill]] }
 0x241   : > { %s3429_s23 = sld [smem:[#allocation14_spill]]  ;;  %s3430_s20 = sld [smem:[#allocation22_spill]] }
 0x242   : > { %s3431_s8 = sld [smem:[#allocation17_spill]]  ;;  %s3432_s22 = sld [smem:[#allocation18_spill]] }
 0x243   : > { %s3433_s30 = sld [smem:[#allocation19_spill]]  ;;  %s3434_s24 = sld [smem:[#allocation20_spill]] }
 0x244   : > { %s3435_s12 = smov %s2585_s13  ;;  %s3436_s13 = smov %s3425_s28 }
 0x245   : > { %s3437_s15 = smov %s2597_s16  ;;  %s3439_s18 = smov %s2609_s19 }
 0x246   : > { %s3438_s16 = smov %s3427_s21  ;;  %21 = sbr.rel (!%p3313_p1) target bundleno = 15 (0xf), region = 101 }
 0x247   : > { %s3440_s19 = smov %s3429_s23 }
 0x248   : > { %s3441_s21 = smov %s3431_s8 }
 0x249   : > { %s3442_s23 = smov %s3433_s30 }
 0x24d   :  { %1711 = vsyncpa [#allocation3], 1 }
 0x24e   :  { %1713 = vsyncpa [#allocation3 + $0x1], 1 }
 0x24f   :  { %1714 = vsyncpa [#allocation6], 1 }
 0x250   :  { %1716 = vsyncpa [#allocation6 + $0x1], 1 }
 0x251   :  { %1717 = vsyncpa [#allocation4], 1 }
 0x252   :  { %1719 = vsyncpa [#allocation4 + $0x1], 1 }

</bundles_post_ra>
